<compile_context>
chip_gen: v6e
topology: v6e:2x2x1
jax: 0.10.0
libtpu: 0.0.40
codegen_flags: <defaults>
</compile_context>

<pallas_src>
import jax
import jax.numpy as jnp
from jax.experimental import pallas as pl
from jax.experimental.pallas import tpu as pltpu


def _round_up(x: int, m: int) -> int:
    return ((x + m - 1) // m) * m


def _erf(x):
    """erf via Abramowitz & Stegun 7.1.26 (max abs err ~1.5e-7).

    Uses only primitives guaranteed to lower in Mosaic (exp / abs / where /
    polynomial / divide).
    """
    p = 0.3275911
    a1, a2, a3, a4, a5 = (0.254829592, -0.284496736, 1.421413741,
                          -1.453152027, 1.061405429)
    ax = jnp.abs(x)
    t = 1.0 / (1.0 + p * ax)
    poly = ((((a5 * t + a4) * t + a3) * t + a2) * t + a1) * t
    y = 1.0 - poly * jnp.exp(-ax * ax)
    return jnp.where(x < 0.0, -y, y)


def _gelu_exact(x):
    # nn.GELU() (erf form).  Dropout around it is identity at inference.
    return 0.5 * x * (1.0 + _erf(x * 0.7071067811865476))


def head_kernel(h_ref, m_ref, wd_ref, bd_ref, wo_ref, bo_ref,
                o_ref, acc_ref, cnt_ref):
    """Masked average pool -> dense -> GELU -> out_proj.

    h_ref   : (Bt, St, Hp) bf16 hidden-state tile (streamed)
    m_ref   : (Bt, St)     bf16 attention-mask tile (streamed)
    wd_ref  : (Hp, Hp)     bf16 dense weight (in, out)   -- VMEM resident
    bd_ref  : (1, Hp)      f32 dense bias                -- VMEM resident
    wo_ref  : (Hp, Cp)     bf16 out_proj weight (in,out) -- VMEM resident
    bo_ref  : (1, Cp)      f32 out_proj bias             -- VMEM resident
    o_ref   : (Bt, Cp)     f32 logits (lane-dense, padded classes)
    acc_ref : (Bt, Hp)     f32 masked-sum accumulator (scratch)
    cnt_ref : (Bt, 1)      f32 valid-token-count accumulator (scratch)
    """
    s = pl.program_id(1)

    @pl.when(s == 0)
    def _():
        acc_ref[...] = jnp.zeros_like(acc_ref)
        cnt_ref[...] = jnp.zeros_like(cnt_ref)

    # Masked partial sum over this sequence tile.
    # The multiply runs in bf16 (exact for a 0/1 mask; halves VPU work on
    # v6e/v7x, neutral on v5e where bf16 VALU ops upcast); accumulation f32.
    m = m_ref[...]                                   # (Bt, St) bf16
    masked = h_ref[...] * m[..., None]               # (Bt, St, Hp) bf16
    acc_ref[...] += jnp.sum(masked.astype(jnp.float32), axis=1)
    cnt_ref[...] += jnp.sum(m.astype(jnp.float32), axis=1, keepdims=True)

    @pl.when(s == pl.num_programs(1) - 1)
    def _():
        # Clamp only protects fully-padded (grid padding) batch rows; every
        # real row has count >= 1.
        inv = pl.reciprocal(jnp.maximum(cnt_ref[...], 1.0), approx=False)
        pooled = (acc_ref[...] * inv).astype(jnp.bfloat16)    # (Bt, Hp)
        # dropout = identity at inference.
        x = jnp.dot(pooled, wd_ref[...],
                    preferred_element_type=jnp.float32) + bd_ref[...]
        x = _gelu_exact(x)
        o_ref[...] = jnp.dot(x.astype(jnp.bfloat16), wo_ref[...],
                             preferred_element_type=jnp.float32) + bo_ref[...]


def _choose_s_tiling(S: int, cap: int):
    """Pick (S_tile, S_pad) with S_tile | S_pad.

    S_tile is a multiple of 16 (bf16 sublane packing).  When the sequence
    axis is actually tiled, S_tile is also a multiple of 128 so that the 2-D
    mask block keeps a lane-aligned last dim.
    """
    cap = max(128, cap - cap % 128)
    s_pad16 = _round_up(S, 16)
    if s_pad16 <= cap:
        return s_pad16, s_pad16          # single S step; block == full extent
    s_pad = _round_up(S, 128)
    for st in range(cap, 127, -128):
        if s_pad % st == 0:
            return st, s_pad
    return 128, s_pad                    # unreachable (128 divides s_pad)


def _make_head_call(B_pad, S_pad, H_pad, C_pad, b_tile, S_tile, vmem_limit,
                    single_buffer_consts):
    const_kwargs = {}
    if single_buffer_consts:
        # Constant-index-map blocks don't need a second pipeline buffer
        # (halves their VMEM footprint -- matters for large H on v7x).
        const_kwargs = dict(pipeline_mode=pl.Buffered(1))

    def const_spec(shape):
        return pl.BlockSpec(shape, lambda b, s: (0, 0), **const_kwargs)

    grid = (B_pad // b_tile, S_pad // S_tile)
    return pl.pallas_call(
        head_kernel,
        out_shape=jax.ShapeDtypeStruct((B_pad, C_pad), jnp.float32),
        grid_spec=pltpu.PrefetchScalarGridSpec(
            num_scalar_prefetch=0,
            grid=grid,
            in_specs=[
                # streamed hidden-state tile
                pl.BlockSpec((b_tile, S_tile, H_pad), lambda b, s: (b, s, 0)),
                # streamed bf16 mask tile
                pl.BlockSpec((b_tile, S_tile), lambda b, s: (b, s)),
                # weights / biases: constant index_map -> fetched once, resident
                const_spec((H_pad, H_pad)),
                const_spec((1, H_pad)),
                const_spec((H_pad, C_pad)),
                const_spec((1, C_pad)),
            ],
            out_specs=pl.BlockSpec((b_tile, C_pad), lambda b, s: (b, 0)),
            scratch_shapes=[pltpu.VMEM((b_tile, H_pad), jnp.float32),
                            pltpu.VMEM((b_tile, 1), jnp.float32)],
        ),
        compiler_params=pltpu.CompilerParams(
            dimension_semantics=("parallel", "arbitrary"),
            vmem_limit_bytes=vmem_limit,
        ),
    )


def classifier_head(last_hidden_state, attention_mask,
                    w_dense, b_dense, w_out, b_out):
    B, S, H = last_hidden_state.shape
    C = w_out.shape[1]

    H_pad = _round_up(H, 128)
    C_pad = _round_up(C, 128)

    # Per-generation VMEM budget: ~3/4 of physical, capped at 100 MiB
    # (v5e/v6e: 128 MiB physical -> ~96-100 MiB; v7x: 64 MiB -> 48 MiB).
    try:
        phys_vmem = pltpu.get_tpu_info().vmem_capacity_bytes
    except Exception:
        phys_vmem = 64 * 1024 * 1024
    vmem_limit = min((phys_vmem * 3) // 4, 100 * 1024 * 1024)

    # Budget for the double-buffered hidden-state stream: subtract the
    # (conservatively double-buffered) bf16 weights + headroom for mask /
    # output / scratch.
    weight_vmem = 2 * ((H_pad * H_pad + H_pad * C_pad) * 2
                       + (H_pad + C_pad) * 4)
    h_stream_budget = max(4 * 1024 * 1024,
                          vmem_limit - weight_vmem - 6 * 1024 * 1024)
    h_per_buf = h_stream_budget // 2

    # Batch tile: up to 128 (full MXU height on all generations); shrink if a
    # 128-row S slab of it would blow the per-buffer budget (huge H).
    B_pad8 = _round_up(B, 8)
    b_tile = min(128, B_pad8)
    while b_tile > 8 and b_tile * 128 * H_pad * 2 > h_per_buf:
        b_tile = max(8, ((b_tile // 2) // 8) * 8)
    # Keep >=2 blocks on the parallel batch axis when the batch allows it
    # (v7x: lets the grid shard across the chip's 2 TensorCores).
    if B > 8 and b_tile >= B_pad8:
        b_tile = max(8, _round_up(B_pad8 // 2, 8))
    B_pad = _round_up(B, b_tile)

    # Sequence tile: as big as the per-buffer budget allows, <= 512.
    s_cap = min(512, max(128,
                         ((h_per_buf // (b_tile * H_pad * 2)) // 128) * 128))
    S_tile, S_pad = _choose_s_tiling(S, s_cap)

    # --- inputs (avoid padded copies of the dominant tensor when aligned) ---
    h_bf = last_hidden_state.astype(jnp.bfloat16)
    if (B_pad, S_pad, H_pad) != (B, S, H):
        h = jnp.zeros((B_pad, S_pad, H_pad), jnp.bfloat16)
        h = h.at[:B, :S, :H].set(h_bf)
    else:
        h = h_bf                          # fast path: no extra HBM pass

    m_bf = attention_mask.astype(jnp.bfloat16)
    if (B_pad, S_pad) != (B, S):
        m = jnp.zeros((B_pad, S_pad), jnp.bfloat16).at[:B, :S].set(m_bf)
    else:
        m = m_bf

    # Weights as bf16 (MXU-native); biases stay f32 (tiny).
    wd = jnp.zeros((H_pad, H_pad), jnp.bfloat16).at[:H, :H].set(
        w_dense.astype(jnp.bfloat16))
    bd = jnp.zeros((1, H_pad), jnp.float32).at[0, :H].set(
        b_dense.astype(jnp.float32))
    wo = jnp.zeros((H_pad, C_pad), jnp.bfloat16).at[:H, :C].set(
        w_out.astype(jnp.bfloat16))
    bo = jnp.zeros((1, C_pad), jnp.float32).at[0, :C].set(
        b_out.astype(jnp.float32))

    last_err = None
    for single_buf in (True, False):
        try:
            fn = _make_head_call(B_pad, S_pad, H_pad, C_pad, b_tile, S_tile,
                                 vmem_limit, single_buf)
            out = fn(h, m, wd, bd, wo, bo)
            return out[:B, :C]
        except Exception as e:            # pl.Buffered(1) unsupported -> retry
            last_err = e
    raise last_err


if __name__ == "__main__":
    # Small shapes consistent with the forward pass.
    B, S, H, C = 2, 8, 32, 4
    VOCAB = 64

    key = jax.random.PRNGKey(0)
    k_emb, k_ids, k_wd, k_bd, k_wo, k_bo = jax.random.split(key, 6)

    # TODO(synk): AutoModel.from_pretrained backbone has no Pallas equivalent;
    # deterministic embedding lookup stands in for it.
    emb_table = jax.random.normal(k_emb, (VOCAB, H), dtype=jnp.float32) * 0.02
    input_ids = jax.random.randint(k_ids, (B, S), 0, VOCAB)
    attention_mask = jnp.array(
        [[1, 1, 1, 1, 1, 1, 1, 1],
         [1, 1, 1, 1, 1, 0, 0, 0]], dtype=jnp.int32)

    last_hidden_state = emb_table[input_ids]            # (B, S, H)

    # Deterministic head parameters (stored as (in, out)).
    w_dense = jax.random.normal(k_wd, (H, H), dtype=jnp.float32) * 0.02
    b_dense = jax.random.normal(k_bd, (H,), dtype=jnp.float32) * 0.02
    w_out = jax.random.normal(k_wo, (H, C), dtype=jnp.float32) * 0.02
    b_out = jax.random.normal(k_bo, (C,), dtype=jnp.float32) * 0.02

    logits = classifier_head(last_hidden_state, attention_mask,
                             w_dense, b_dense, w_out, b_out)
    logits = jax.block_until_ready(logits)
    assert logits.shape == (B, C)

    # Pure-JAX reference of the head, applying the same bf16 quantization
    # points as the kernel (hidden state, pooled, dense weights, GELU output).
    h_q = last_hidden_state.astype(jnp.bfloat16).astype(jnp.float32)
    m_f = attention_mask.astype(jnp.float32)
    pooled_ref = (h_q * m_f[..., None]).sum(1) / m_f.sum(1)[..., None]
    wd_q = w_dense.astype(jnp.bfloat16).astype(jnp.float32)
    wo_q = w_out.astype(jnp.bfloat16).astype(jnp.float32)
    pooled_q = pooled_ref.astype(jnp.bfloat16).astype(jnp.float32)
    x_ref = jax.nn.gelu(pooled_q @ wd_q + b_dense, approximate=False)
    x_q = x_ref.astype(jnp.bfloat16).astype(jnp.float32)
    logits_ref = x_q @ wo_q + b_out

    assert jnp.allclose(logits, logits_ref, atol=2e-4, rtol=2e-3), (
        logits, logits_ref)

    print("KERNEL_OK")
</pallas_src>

<mosaic_0001>
module attributes {stable_mosaic.version = 11 : i64} {
  func.func @head_kernel(%arg0: i32, %arg1: i32, %arg2: memref<8x16x128xbf16, #tpu.memory_space<vmem>>, %arg3: memref<8x16xbf16, #tpu.memory_space<vmem>>, %arg4: memref<128x128xbf16, #tpu.memory_space<vmem>>, %arg5: memref<1x128xf32, #tpu.memory_space<vmem>>, %arg6: memref<128x128xbf16, #tpu.memory_space<vmem>>, %arg7: memref<1x128xf32, #tpu.memory_space<vmem>>, %arg8: memref<8x128xf32, #tpu.memory_space<vmem>>, %arg9: memref<8x128xf32, #tpu.memory_space<vmem>>, %arg10: memref<8x1xf32, #tpu.memory_space<vmem>>) attributes {dimension_semantics = [#tpu.dimension_semantics<parallel>, #tpu.dimension_semantics<arbitrary>], iteration_bounds = array<i64: 1, 1>, scalar_prefetch = 0 : i64, scratch_operands = 2 : i64, tpu.core_type = #tpu.core_type<tc>, window_params = [{transform_indices = @transform_0, window_bounds = array<i64: 8, 16, 128>}, {transform_indices = @transform_1, window_bounds = array<i64: 8, 16>}, {pipeline_mode = #tpu.pipeline_mode<synchronous>, transform_indices = @transform_2, window_bounds = array<i64: 128, 128>}, {pipeline_mode = #tpu.pipeline_mode<synchronous>, transform_indices = @transform_3, window_bounds = array<i64: 1, 128>}, {pipeline_mode = #tpu.pipeline_mode<synchronous>, transform_indices = @transform_4, window_bounds = array<i64: 128, 128>}, {pipeline_mode = #tpu.pipeline_mode<synchronous>, transform_indices = @transform_5, window_bounds = array<i64: 1, 128>}, {transform_indices = @transform_6, window_bounds = array<i64: 8, 128>}]} {
    %c0_i32 = arith.constant 0 : i32
    %0 = arith.cmpi eq, %arg1, %c0_i32 : i32
    %1 = arith.extui %0 : i1 to i32
    %c0_i32_0 = arith.constant 0 : i32
    %2 = arith.cmpi ne, %1, %c0_i32_0 : i32
    scf.if %2 {
      %cst_16 = arith.constant 0.000000e+00 : f32
      %22 = vector.broadcast %cst_16 : f32 to vector<8x128xf32>
      %c0_17 = arith.constant 0 : index
      %c0_18 = arith.constant 0 : index
      %23 = vector.load %arg9[%c0_17, %c0_18] : memref<8x128xf32, #tpu.memory_space<vmem>>, vector<8x128xf32>
      tpu.vector_store %arg9[%c0_17, %c0_18], %22 {strides = array<i32>} : memref<8x128xf32, #tpu.memory_space<vmem>>, vector<8x128xf32>,
      %cst_19 = arith.constant 0.000000e+00 : f32
      %24 = vector.broadcast %cst_19 : f32 to vector<8x1xf32>
      %c0_20 = arith.constant 0 : index
      %c0_21 = arith.constant 0 : index
      %25 = vector.load %arg10[%c0_20, %c0_21] : memref<8x1xf32, #tpu.memory_space<vmem>>, vector<8x1xf32>
      tpu.vector_store %arg10[%c0_20, %c0_21], %24 {strides = array<i32>} : memref<8x1xf32, #tpu.memory_space<vmem>>, vector<8x1xf32>,
    } else {
    }
    %c0 = arith.constant 0 : index
    %c0_1 = arith.constant 0 : index
    %3 = vector.load %arg3[%c0, %c0_1] : memref<8x16xbf16, #tpu.memory_space<vmem>>, vector<8x16xbf16>
    %c0_2 = arith.constant 0 : index
    %c0_3 = arith.constant 0 : index
    %c0_4 = arith.constant 0 : index
    %4 = vector.load %arg2[%c0_2, %c0_3, %c0_4] : memref<8x16x128xbf16, #tpu.memory_space<vmem>>, vector<8x16x128xbf16>
    %5 = vector.shape_cast %3 : vector<8x16xbf16> to vector<8x16x1xbf16>
    %6 = vector.broadcast %5 : vector<8x16x1xbf16> to vector<8x16x128xbf16>
    %7 = arith.mulf %4, %6 : vector<8x16x128xbf16>
    %c0_5 = arith.constant 0 : index
    %c0_6 = arith.constant 0 : index
    %8 = vector.load %arg9[%c0_5, %c0_6] : memref<8x128xf32, #tpu.memory_space<vmem>>, vector<8x128xf32>
    %9 = arith.extf %7 : vector<8x16x128xbf16> to vector<8x16x128xf32>
    %cst = arith.constant dense<0.000000e+00> : vector<8x128xf32>
    %10 = vector.multi_reduction <add>, %9, %cst [1] : vector<8x16x128xf32> to vector<8x128xf32>
    %11 = arith.addf %8, %10 : vector<8x128xf32>
    %c0_7 = arith.constant 0 : index
    %c0_8 = arith.constant 0 : index
    %12 = vector.load %arg9[%c0_7, %c0_8] : memref<8x128xf32, #tpu.memory_space<vmem>>, vector<8x128xf32>
    tpu.vector_store %arg9[%c0_7, %c0_8], %11 {strides = array<i32>} : memref<8x128xf32, #tpu.memory_space<vmem>>, vector<8x128xf32>,
    %c0_9 = arith.constant 0 : index
    %c0_10 = arith.constant 0 : index
    %13 = vector.load %arg10[%c0_9, %c0_10] : memref<8x1xf32, #tpu.memory_space<vmem>>, vector<8x1xf32>
    %14 = arith.extf %3 : vector<8x16xbf16> to vector<8x16xf32>
    %cst_11 = arith.constant dense<0.000000e+00> : vector<8xf32>
    %15 = vector.multi_reduction <add>, %14, %cst_11 [1] : vector<8x16xf32> to vector<8xf32>
    %16 = vector.shape_cast %15 : vector<8xf32> to vector<8x1xf32>
    %17 = arith.addf %13, %16 : vector<8x1xf32>
    %c0_12 = arith.constant 0 : index
    %c0_13 = arith.constant 0 : index
    %18 = vector.load %arg10[%c0_12, %c0_13] : memref<8x1xf32, #tpu.memory_space<vmem>>, vector<8x1xf32>
    tpu.vector_store %arg10[%c0_12, %c0_13], %17 {strides = array<i32>} : memref<8x1xf32, #tpu.memory_space<vmem>>, vector<8x1xf32>,
    %c0_i32_14 = arith.constant 0 : i32
    %19 = arith.cmpi eq, %arg1, %c0_i32_14 : i32
    %20 = arith.extui %19 : i1 to i32
    %c0_i32_15 = arith.constant 0 : i32
    %21 = arith.cmpi ne, %20, %c0_i32_15 : i32
    scf.if %21 {
      %c0_16 = arith.constant 0 : index
      %c0_17 = arith.constant 0 : index
      %22 = vector.load %arg10[%c0_16, %c0_17] : memref<8x1xf32, #tpu.memory_space<vmem>>, vector<8x1xf32>
      %cst_18 = arith.constant 1.000000e+00 : f32
      %23 = vector.broadcast %cst_18 : f32 to vector<8x1xf32>
      %24 = arith.maximumf %22, %23 : vector<8x1xf32>
      %25 = tpu.reciprocal %24 : vector<8x1xf32> -> vector<8x1xf32>
      %c0_19 = arith.constant 0 : index
      %c0_20 = arith.constant 0 : index
      %26 = vector.load %arg9[%c0_19, %c0_20] : memref<8x128xf32, #tpu.memory_space<vmem>>, vector<8x128xf32>
      %27 = vector.broadcast %25 : vector<8x1xf32> to vector<8x128xf32>
      %28 = arith.mulf %26, %27 : vector<8x128xf32>
      %29 = arith.truncf %28 : vector<8x128xf32> to vector<8x128xbf16>
      %c0_21 = arith.constant 0 : index
      %c0_22 = arith.constant 0 : index
      %30 = vector.load %arg4[%c0_21, %c0_22] : memref<128x128xbf16, #tpu.memory_space<vmem>>, vector<128x128xbf16>
      %cst_23 = arith.constant dense<0.000000e+00> : vector<8x128xf32>
      %31 = tpu.matmul %29, %30, %cst_23 {dimension_numbers = #tpu.dot_dimension_numbers<[1], [0], [0], [1], [0, 0, 1, 1], [], []>} : vector<8x128xbf16>, vector<128x128xbf16>, vector<8x128xf32> -> vector<8x128xf32>
      %c0_24 = arith.constant 0 : index
      %c0_25 = arith.constant 0 : index
      %32 = vector.load %arg5[%c0_24, %c0_25] : memref<1x128xf32, #tpu.memory_space<vmem>>, vector<1x128xf32>
      %33 = vector.broadcast %32 : vector<1x128xf32> to vector<8x128xf32>
      %34 = arith.addf %31, %33 : vector<8x128xf32>
      %cst_26 = arith.constant 5.000000e-01 : f32
      %35 = vector.broadcast %cst_26 : f32 to vector<8x128xf32>
      %36 = arith.mulf %35, %34 : vector<8x128xf32>
      %cst_27 = arith.constant 0.707106769 : f32
      %37 = vector.broadcast %cst_27 : f32 to vector<8x128xf32>
      %38 = arith.mulf %34, %37 : vector<8x128xf32>
      %39 = math.absf %38 : vector<8x128xf32>
      %cst_28 = arith.constant 0.327591091 : f32
      %40 = vector.broadcast %cst_28 : f32 to vector<8x128xf32>
      %41 = arith.mulf %40, %39 : vector<8x128xf32>
      %cst_29 = arith.constant 1.000000e+00 : f32
      %42 = vector.broadcast %cst_29 : f32 to vector<8x128xf32>
      %43 = arith.addf %42, %41 : vector<8x128xf32>
      %cst_30 = arith.constant 1.000000e+00 : f32
      %44 = vector.broadcast %cst_30 : f32 to vector<8x128xf32>
      %45 = arith.divf %44, %43 : vector<8x128xf32>
      %cst_31 = arith.constant 1.06140542 : f32
      %46 = vector.broadcast %cst_31 : f32 to vector<8x128xf32>
      %47 = arith.mulf %46, %45 : vector<8x128xf32>
      %cst_32 = arith.constant -1.45315206 : f32
      %48 = vector.broadcast %cst_32 : f32 to vector<8x128xf32>
      %49 = arith.addf %47, %48 : vector<8x128xf32>
      %50 = arith.mulf %49, %45 : vector<8x128xf32>
      %cst_33 = arith.constant 1.42141378 : f32
      %51 = vector.broadcast %cst_33 : f32 to vector<8x128xf32>
      %52 = arith.addf %50, %51 : vector<8x128xf32>
      %53 = arith.mulf %52, %45 : vector<8x128xf32>
      %cst_34 = arith.constant -0.284496725 : f32
      %54 = vector.broadcast %cst_34 : f32 to vector<8x128xf32>
      %55 = arith.addf %53, %54 : vector<8x128xf32>
      %56 = arith.mulf %55, %45 : vector<8x128xf32>
      %cst_35 = arith.constant 0.254829586 : f32
      %57 = vector.broadcast %cst_35 : f32 to vector<8x128xf32>
      %58 = arith.addf %56, %57 : vector<8x128xf32>
      %59 = arith.mulf %58, %45 : vector<8x128xf32>
      %cst_36 = arith.constant 0.000000e+00 : f32
      %60 = vector.broadcast %cst_36 : f32 to vector<8x128xf32>
      %61 = arith.subf %60, %39 : vector<8x128xf32>
      %62 = arith.mulf %61, %39 : vector<8x128xf32>
      %63 = math.exp %62 : vector<8x128xf32>
      %64 = arith.mulf %59, %63 : vector<8x128xf32>
      %cst_37 = arith.constant 1.000000e+00 : f32
      %65 = vector.broadcast %cst_37 : f32 to vector<8x128xf32>
      %66 = arith.subf %65, %64 : vector<8x128xf32>
      %cst_38 = arith.constant 0.000000e+00 : f32
      %67 = vector.broadcast %cst_38 : f32 to vector<8x128xf32>
      %68 = arith.cmpf olt, %38, %67 : vector<8x128xf32>
      %cst_39 = arith.constant 0.000000e+00 : f32
      %69 = vector.broadcast %cst_39 : f32 to vector<8x128xf32>
      %70 = arith.subf %69, %66 : vector<8x128xf32>
      %71 = arith.select %68, %70, %66 : vector<8x128xi1>, vector<8x128xf32>
      %cst_40 = arith.constant 1.000000e+00 : f32
      %72 = vector.broadcast %cst_40 : f32 to vector<8x128xf32>
      %73 = arith.addf %72, %71 : vector<8x128xf32>
      %74 = arith.mulf %36, %73 : vector<8x128xf32>
      %75 = arith.truncf %74 : vector<8x128xf32> to vector<8x128xbf16>
      %c0_41 = arith.constant 0 : index
      %c0_42 = arith.constant 0 : index
      %76 = vector.load %arg6[%c0_41, %c0_42] : memref<128x128xbf16, #tpu.memory_space<vmem>>, vector<128x128xbf16>
      %cst_43 = arith.constant dense<0.000000e+00> : vector<8x128xf32>
      %77 = tpu.matmul %75, %76, %cst_43 {dimension_numbers = #tpu.dot_dimension_numbers<[1], [0], [0], [1], [0, 0, 1, 1], [], []>} : vector<8x128xbf16>, vector<128x128xbf16>, vector<8x128xf32> -> vector<8x128xf32>
      %c0_44 = arith.constant 0 : index
      %c0_45 = arith.constant 0 : index
      %78 = vector.load %arg7[%c0_44, %c0_45] : memref<1x128xf32, #tpu.memory_space<vmem>>, vector<1x128xf32>
      %79 = vector.broadcast %78 : vector<1x128xf32> to vector<8x128xf32>
      %80 = arith.addf %77, %79 : vector<8x128xf32>
      %c0_46 = arith.constant 0 : index
      %c0_47 = arith.constant 0 : index
      %81 = vector.load %arg8[%c0_46, %c0_47] : memref<8x128xf32, #tpu.memory_space<vmem>>, vector<8x128xf32>
      tpu.vector_store %arg8[%c0_46, %c0_47], %80 {strides = array<i32>} : memref<8x128xf32, #tpu.memory_space<vmem>>, vector<8x128xf32>,
    } else {
    }
    return
  }
  func.func @transform_0(%arg0: i32, %arg1: i32) -> (i32, i32, i32) {
    %c0_i32 = arith.constant 0 : i32
    %c0_i32_0 = arith.constant 0 : i32
    return %arg0, %arg1, %c0_i32 : i32, i32, i32
  }
  func.func @transform_1(%arg0: i32, %arg1: i32) -> (i32, i32) {
    %c0_i32 = arith.constant 0 : i32
    return %arg0, %arg1 : i32, i32
  }
  func.func @transform_2(%arg0: i32, %arg1: i32) -> (i32, i32) {
    %c0_i32 = arith.constant 0 : i32
    %c0_i32_0 = arith.constant 0 : i32
    %c0_i32_1 = arith.constant 0 : i32
    return %c0_i32, %c0_i32_0 : i32, i32
  }
  func.func @transform_3(%arg0: i32, %arg1: i32) -> (i32, i32) {
    %c0_i32 = arith.constant 0 : i32
    %c0_i32_0 = arith.constant 0 : i32
    %c0_i32_1 = arith.constant 0 : i32
    return %c0_i32, %c0_i32_0 : i32, i32
  }
  func.func @transform_4(%arg0: i32, %arg1: i32) -> (i32, i32) {
    %c0_i32 = arith.constant 0 : i32
    %c0_i32_0 = arith.constant 0 : i32
    %c0_i32_1 = arith.constant 0 : i32
    return %c0_i32, %c0_i32_0 : i32, i32
  }
  func.func @transform_5(%arg0: i32, %arg1: i32) -> (i32, i32) {
    %c0_i32 = arith.constant 0 : i32
    %c0_i32_0 = arith.constant 0 : i32
    %c0_i32_1 = arith.constant 0 : i32
    return %c0_i32, %c0_i32_0 : i32, i32
  }
  func.func @transform_6(%arg0: i32, %arg1: i32) -> (i32, i32) {
    %c0_i32 = arith.constant 0 : i32
    %c0_i32_0 = arith.constant 0 : i32
    return %arg0, %c0_i32 : i32, i32
  }
}

module attributes {stable_mosaic.version = 11 : i64} {
  func.func @head_kernel(%arg0: i32, %arg1: i32, %arg2: memref<8x16x128xbf16, #tpu.memory_space<vmem>>, %arg3: memref<8x16xbf16, #tpu.memory_space<vmem>>, %arg4: memref<128x128xbf16, #tpu.memory_space<vmem>>, %arg5: memref<1x128xf32, #tpu.memory_space<vmem>>, %arg6: memref<128x128xbf16, #tpu.memory_space<vmem>>, %arg7: memref<1x128xf32, #tpu.memory_space<vmem>>, %arg8: memref<8x128xf32, #tpu.memory_space<vmem>>, %arg9: memref<8x128xf32, #tpu.memory_space<vmem>>, %arg10: memref<8x1xf32, #tpu.memory_space<vmem>>) attributes {dimension_semantics = [#tpu.dimension_semantics<parallel>, #tpu.dimension_semantics<arbitrary>], iteration_bounds = array<i64: 1, 1>, scalar_prefetch = 0 : i64, scratch_operands = 2 : i64, tpu.core_type = #tpu.core_type<tc>, window_params = [{transform_indices = @transform_0, window_bounds = array<i64: 8, 16, 128>}, {transform_indices = @transform_1, window_bounds = array<i64: 8, 16>}, {pipeline_mode = #tpu.pipeline_mode<synchronous>, transform_indices = @transform_2, window_bounds = array<i64: 128, 128>}, {pipeline_mode = #tpu.pipeline_mode<synchronous>, transform_indices = @transform_3, window_bounds = array<i64: 1, 128>}, {pipeline_mode = #tpu.pipeline_mode<synchronous>, transform_indices = @transform_4, window_bounds = array<i64: 128, 128>}, {pipeline_mode = #tpu.pipeline_mode<synchronous>, transform_indices = @transform_5, window_bounds = array<i64: 1, 128>}, {transform_indices = @transform_6, window_bounds = array<i64: 8, 128>}]} {
    %c0_i32 = arith.constant 0 : i32
    %0 = arith.cmpi eq, %arg1, %c0_i32 : i32
    %1 = arith.extui %0 : i1 to i32
    %c0_i32_0 = arith.constant 0 : i32
    %2 = arith.cmpi ne, %1, %c0_i32_0 : i32
    scf.if %2 {
      %cst_16 = arith.constant 0.000000e+00 : f32
      %22 = vector.broadcast %cst_16 : f32 to vector<8x128xf32>
      %c0_17 = arith.constant 0 : index
      %c0_18 = arith.constant 0 : index
      %23 = vector.load %arg9[%c0_17, %c0_18] : memref<8x128xf32, #tpu.memory_space<vmem>>, vector<8x128xf32>
      tpu.vector_store %arg9[%c0_17, %c0_18], %22 {strides = array<i32>} : memref<8x128xf32, #tpu.memory_space<vmem>>, vector<8x128xf32>,
      %cst_19 = arith.constant 0.000000e+00 : f32
      %24 = vector.broadcast %cst_19 : f32 to vector<8x1xf32>
      %c0_20 = arith.constant 0 : index
      %c0_21 = arith.constant 0 : index
      %25 = vector.load %arg10[%c0_20, %c0_21] : memref<8x1xf32, #tpu.memory_space<vmem>>, vector<8x1xf32>
      tpu.vector_store %arg10[%c0_20, %c0_21], %24 {strides = array<i32>} : memref<8x1xf32, #tpu.memory_space<vmem>>, vector<8x1xf32>,
    } else {
    }
    %c0 = arith.constant 0 : index
    %c0_1 = arith.constant 0 : index
    %3 = vector.load %arg3[%c0, %c0_1] : memref<8x16xbf16, #tpu.memory_space<vmem>>, vector<8x16xbf16>
    %c0_2 = arith.constant 0 : index
    %c0_3 = arith.constant 0 : index
    %c0_4 = arith.constant 0 : index
    %4 = vector.load %arg2[%c0_2, %c0_3, %c0_4] : memref<8x16x128xbf16, #tpu.memory_space<vmem>>, vector<8x16x128xbf16>
    %5 = vector.shape_cast %3 : vector<8x16xbf16> to vector<8x16x1xbf16>
    %6 = vector.broadcast %5 : vector<8x16x1xbf16> to vector<8x16x128xbf16>
    %7 = arith.mulf %4, %6 : vector<8x16x128xbf16>
    %c0_5 = arith.constant 0 : index
    %c0_6 = arith.constant 0 : index
    %8 = vector.load %arg9[%c0_5, %c0_6] : memref<8x128xf32, #tpu.memory_space<vmem>>, vector<8x128xf32>
    %9 = arith.extf %7 : vector<8x16x128xbf16> to vector<8x16x128xf32>
    %cst = arith.constant dense<0.000000e+00> : vector<8x128xf32>
    %10 = vector.multi_reduction <add>, %9, %cst [1] : vector<8x16x128xf32> to vector<8x128xf32>
    %11 = arith.addf %8, %10 : vector<8x128xf32>
    %c0_7 = arith.constant 0 : index
    %c0_8 = arith.constant 0 : index
    %12 = vector.load %arg9[%c0_7, %c0_8] : memref<8x128xf32, #tpu.memory_space<vmem>>, vector<8x128xf32>
    tpu.vector_store %arg9[%c0_7, %c0_8], %11 {strides = array<i32>} : memref<8x128xf32, #tpu.memory_space<vmem>>, vector<8x128xf32>,
    %c0_9 = arith.constant 0 : index
    %c0_10 = arith.constant 0 : index
    %13 = vector.load %arg10[%c0_9, %c0_10] : memref<8x1xf32, #tpu.memory_space<vmem>>, vector<8x1xf32>
    %14 = arith.extf %3 : vector<8x16xbf16> to vector<8x16xf32>
    %cst_11 = arith.constant dense<0.000000e+00> : vector<8xf32>
    %15 = vector.multi_reduction <add>, %14, %cst_11 [1] : vector<8x16xf32> to vector<8xf32>
    %16 = vector.shape_cast %15 : vector<8xf32> to vector<8x1xf32>
    %17 = arith.addf %13, %16 : vector<8x1xf32>
    %c0_12 = arith.constant 0 : index
    %c0_13 = arith.constant 0 : index
    %18 = vector.load %arg10[%c0_12, %c0_13] : memref<8x1xf32, #tpu.memory_space<vmem>>, vector<8x1xf32>
    tpu.vector_store %arg10[%c0_12, %c0_13], %17 {strides = array<i32>} : memref<8x1xf32, #tpu.memory_space<vmem>>, vector<8x1xf32>,
    %c0_i32_14 = arith.constant 0 : i32
    %19 = arith.cmpi eq, %arg1, %c0_i32_14 : i32
    %20 = arith.extui %19 : i1 to i32
    %c0_i32_15 = arith.constant 0 : i32
    %21 = arith.cmpi ne, %20, %c0_i32_15 : i32
    scf.if %21 {
      %c0_16 = arith.constant 0 : index
      %c0_17 = arith.constant 0 : index
      %22 = vector.load %arg10[%c0_16, %c0_17] : memref<8x1xf32, #tpu.memory_space<vmem>>, vector<8x1xf32>
      %cst_18 = arith.constant 1.000000e+00 : f32
      %23 = vector.broadcast %cst_18 : f32 to vector<8x1xf32>
      %24 = arith.maximumf %22, %23 : vector<8x1xf32>
      %25 = tpu.reciprocal %24 : vector<8x1xf32> -> vector<8x1xf32>
      %c0_19 = arith.constant 0 : index
      %c0_20 = arith.constant 0 : index
      %26 = vector.load %arg9[%c0_19, %c0_20] : memref<8x128xf32, #tpu.memory_space<vmem>>, vector<8x128xf32>
      %27 = vector.broadcast %25 : vector<8x1xf32> to vector<8x128xf32>
      %28 = arith.mulf %26, %27 : vector<8x128xf32>
      %29 = arith.truncf %28 : vector<8x128xf32> to vector<8x128xbf16>
      %c0_21 = arith.constant 0 : index
      %c0_22 = arith.constant 0 : index
      %30 = vector.load %arg4[%c0_21, %c0_22] : memref<128x128xbf16, #tpu.memory_space<vmem>>, vector<128x128xbf16>
      %cst_23 = arith.constant dense<0.000000e+00> : vector<8x128xf32>
      %31 = tpu.matmul %29, %30, %cst_23 {dimension_numbers = #tpu.dot_dimension_numbers<[1], [0], [0], [1], [0, 0, 1, 1], [], []>} : vector<8x128xbf16>, vector<128x128xbf16>, vector<8x128xf32> -> vector<8x128xf32>
      %c0_24 = arith.constant 0 : index
      %c0_25 = arith.constant 0 : index
      %32 = vector.load %arg5[%c0_24, %c0_25] : memref<1x128xf32, #tpu.memory_space<vmem>>, vector<1x128xf32>
      %33 = vector.broadcast %32 : vector<1x128xf32> to vector<8x128xf32>
      %34 = arith.addf %31, %33 : vector<8x128xf32>
      %cst_26 = arith.constant 5.000000e-01 : f32
      %35 = vector.broadcast %cst_26 : f32 to vector<8x128xf32>
      %36 = arith.mulf %35, %34 : vector<8x128xf32>
      %cst_27 = arith.constant 0.707106769 : f32
      %37 = vector.broadcast %cst_27 : f32 to vector<8x128xf32>
      %38 = arith.mulf %34, %37 : vector<8x128xf32>
      %39 = math.absf %38 : vector<8x128xf32>
      %cst_28 = arith.constant 0.327591091 : f32
      %40 = vector.broadcast %cst_28 : f32 to vector<8x128xf32>
      %41 = arith.mulf %40, %39 : vector<8x128xf32>
      %cst_29 = arith.constant 1.000000e+00 : f32
      %42 = vector.broadcast %cst_29 : f32 to vector<8x128xf32>
      %43 = arith.addf %42, %41 : vector<8x128xf32>
      %cst_30 = arith.constant 1.000000e+00 : f32
      %44 = vector.broadcast %cst_30 : f32 to vector<8x128xf32>
      %45 = arith.divf %44, %43 : vector<8x128xf32>
      %cst_31 = arith.constant 1.06140542 : f32
      %46 = vector.broadcast %cst_31 : f32 to vector<8x128xf32>
      %47 = arith.mulf %46, %45 : vector<8x128xf32>
      %cst_32 = arith.constant -1.45315206 : f32
      %48 = vector.broadcast %cst_32 : f32 to vector<8x128xf32>
      %49 = arith.addf %47, %48 : vector<8x128xf32>
      %50 = arith.mulf %49, %45 : vector<8x128xf32>
      %cst_33 = arith.constant 1.42141378 : f32
      %51 = vector.broadcast %cst_33 : f32 to vector<8x128xf32>
      %52 = arith.addf %50, %51 : vector<8x128xf32>
      %53 = arith.mulf %52, %45 : vector<8x128xf32>
      %cst_34 = arith.constant -0.284496725 : f32
      %54 = vector.broadcast %cst_34 : f32 to vector<8x128xf32>
      %55 = arith.addf %53, %54 : vector<8x128xf32>
      %56 = arith.mulf %55, %45 : vector<8x128xf32>
      %cst_35 = arith.constant 0.254829586 : f32
      %57 = vector.broadcast %cst_35 : f32 to vector<8x128xf32>
      %58 = arith.addf %56, %57 : vector<8x128xf32>
      %59 = arith.mulf %58, %45 : vector<8x128xf32>
      %cst_36 = arith.constant 0.000000e+00 : f32
      %60 = vector.broadcast %cst_36 : f32 to vector<8x128xf32>
      %61 = arith.subf %60, %39 : vector<8x128xf32>
      %62 = arith.mulf %61, %39 : vector<8x128xf32>
      %63 = math.exp %62 : vector<8x128xf32>
      %64 = arith.mulf %59, %63 : vector<8x128xf32>
      %cst_37 = arith.constant 1.000000e+00 : f32
      %65 = vector.broadcast %cst_37 : f32 to vector<8x128xf32>
      %66 = arith.subf %65, %64 : vector<8x128xf32>
      %cst_38 = arith.constant 0.000000e+00 : f32
      %67 = vector.broadcast %cst_38 : f32 to vector<8x128xf32>
      %68 = arith.cmpf olt, %38, %67 : vector<8x128xf32>
      %cst_39 = arith.constant 0.000000e+00 : f32
      %69 = vector.broadcast %cst_39 : f32 to vector<8x128xf32>
      %70 = arith.subf %69, %66 : vector<8x128xf32>
      %71 = arith.select %68, %70, %66 : vector<8x128xi1>, vector<8x128xf32>
      %cst_40 = arith.constant 1.000000e+00 : f32
      %72 = vector.broadcast %cst_40 : f32 to vector<8x128xf32>
      %73 = arith.addf %72, %71 : vector<8x128xf32>
      %74 = arith.mulf %36, %73 : vector<8x128xf32>
      %75 = arith.truncf %74 : vector<8x128xf32> to vector<8x128xbf16>
      %c0_41 = arith.constant 0 : index
      %c0_42 = arith.constant 0 : index
      %76 = vector.load %arg6[%c0_41, %c0_42] : memref<128x128xbf16, #tpu.memory_space<vmem>>, vector<128x128xbf16>
      %cst_43 = arith.constant dense<0.000000e+00> : vector<8x128xf32>
      %77 = tpu.matmul %75, %76, %cst_43 {dimension_numbers = #tpu.dot_dimension_numbers<[1], [0], [0], [1], [0, 0, 1, 1], [], []>} : vector<8x128xbf16>, vector<128x128xbf16>, vector<8x128xf32> -> vector<8x128xf32>
      %c0_44 = arith.constant 0 : index
      %c0_45 = arith.constant 0 : index
      %78 = vector.load %arg7[%c0_44, %c0_45] : memref<1x128xf32, #tpu.memory_space<vmem>>, vector<1x128xf32>
      %79 = vector.broadcast %78 : vector<1x128xf32> to vector<8x128xf32>
      %80 = arith.addf %77, %79 : vector<8x128xf32>
      %c0_46 = arith.constant 0 : index
      %c0_47 = arith.constant 0 : index
      %81 = vector.load %arg8[%c0_46, %c0_47] : memref<8x128xf32, #tpu.memory_space<vmem>>, vector<8x128xf32>
      tpu.vector_store %arg8[%c0_46, %c0_47], %80 {strides = array<i32>} : memref<8x128xf32, #tpu.memory_space<vmem>>, vector<8x128xf32>,
    } else {
    }
    return
  }
  func.func @transform_0(%arg0: i32, %arg1: i32) -> (i32, i32, i32) {
    %c0_i32 = arith.constant 0 : i32
    %c0_i32_0 = arith.constant 0 : i32
    return %arg0, %arg1, %c0_i32 : i32, i32, i32
  }
  func.func @transform_1(%arg0: i32, %arg1: i32) -> (i32, i32) {
    %c0_i32 = arith.constant 0 : i32
    return %arg0, %arg1 : i32, i32
  }
  func.func @transform_2(%arg0: i32, %arg1: i32) -> (i32, i32) {
    %c0_i32 = arith.constant 0 : i32
    %c0_i32_0 = arith.constant 0 : i32
    %c0_i32_1 = arith.constant 0 : i32
    return %c0_i32, %c0_i32_0 : i32, i32
  }
  func.func @transform_3(%arg0: i32, %arg1: i32) -> (i32, i32) {
    %c0_i32 = arith.constant 0 : i32
    %c0_i32_0 = arith.constant 0 : i32
    %c0_i32_1 = arith.constant 0 : i32
    return %c0_i32, %c0_i32_0 : i32, i32
  }
  func.func @transform_4(%arg0: i32, %arg1: i32) -> (i32, i32) {
    %c0_i32 = arith.constant 0 : i32
    %c0_i32_0 = arith.constant 0 : i32
    %c0_i32_1 = arith.constant 0 : i32
    return %c0_i32, %c0_i32_0 : i32, i32
  }
  func.func @transform_5(%arg0: i32, %arg1: i32) -> (i32, i32) {
    %c0_i32 = arith.constant 0 : i32
    %c0_i32_0 = arith.constant 0 : i32
    %c0_i32_1 = arith.constant 0 : i32
    return %c0_i32, %c0_i32_0 : i32, i32
  }
  func.func @transform_6(%arg0: i32, %arg1: i32) -> (i32, i32) {
    %c0_i32 = arith.constant 0 : i32
    %c0_i32_0 = arith.constant 0 : i32
    return %arg0, %c0_i32 : i32, i32
  }
}

</mosaic_0001>

<bundles_post_ra>
// kernel: tpu_custom_call.1
= control target key start
LH: loop header
LB: loop body
LE: loop exit
PB: predicated region body
PF: predicated region fallthrough
CT: control target
= control target key end

     0   :  { %11 = vsyncpa [#allocation5], 0  ;;  %s1041_s0 = inlined_call_operand.hbm [shape: bf16[8,16,128], index: 0, kind: input, shape index: {}]   ;;  %s1042_s1 = inlined_call_operand.hbm [shape: bf16[8,16], index: 1, kind: input, shape index: {}]   ;;  %s1043_s2 = inlined_call_operand.hbm [shape: bf16[128,128], index: 2, kind: input, shape index: {}]   ;;  %s1044_s3 = inlined_call_operand.vmem [shape: f32[1,128], index: 3, kind: input, shape index: {}]   ;;  %s1045_s4 = inlined_call_operand.hbm [shape: bf16[128,128], index: 4, kind: input, shape index: {}]   ;;  %s1046_s5 = inlined_call_operand.vmem [shape: f32[1,128], index: 5, kind: input, shape index: {}]   ;;  %s1047_s6 = inlined_call_operand.hbm [shape: f32[8,128], index: 6, kind: output, shape index: {}]  }
   0x1   :  { %12 = vsyncpa [#allocation8], 0 }
   0x2   :  { %13 = vsyncpa [#allocation11], 0 }
   0x3   :  { %14 = vsyncpa [#allocation6], 0  ;;  %s924_s21 = smov [#allocation7]   ;;  %s925_s23 = smov [#allocation4]  }
   0x4   :  { %s33_s22 = sshll.u32 %s924_s21, 4  ;;  %s20_s24 = sshll.u32 %s925_s23, 4  ;;  %s34_s22 = int_to_ptr.vmem [resolvable:$true] %s33_s22  ;;  %s21_s24 = int_to_ptr.vmem [resolvable:$true] %s20_s24 }
   0x5   :  { %s824_s25 = scalar_lea.vmem %s34_s22, 64  ;;  %p829_p1 = scmp.lt.s32.totalorder %s34_s22, %s34_s22 }
   0x6   :  { %p825_p0 = scmp.ne.s32.totalorder %s34_s22, %s824_s25  ;;  %p830_p2 = scmp.lt.s32.totalorder %s824_s25, %s824_s25 }
   0x8   :  { %p831_p3 = por %p830_p2, %p829_p1 }
   0xa   :  { %p832_p4 = pnand %p831_p3, %p825_p0 }
   0xc   :  { %835 = shalt.err (!%p832_p4)
}
   0xd   :  { %36 = dma.hbm_to_vmem [thread:$0]  %s1042_s1, 64, %s34_s22, [#allocation8]  }
   0xe   :  { %s844_s28 = scalar_lea.vmem %s21_s24, 1024  ;;  %p849_p6 = scmp.lt.s32.totalorder %s21_s24, %s21_s24 }
   0xf   :  { %p845_p5 = scmp.ne.s32.totalorder %s21_s24, %s844_s28  ;;  %p850_p7 = scmp.lt.s32.totalorder %s844_s28, %s844_s28 }
  0x11   :  { %p851_p8 = por %p850_p7, %p849_p6 }
  0x13   :  { %p852_p9 = pnand %p851_p8, %p845_p5 }
  0x15   :  { %855 = shalt.err (!%p852_p9)
}
  0x16   :  { %s926_s29 = smov 64   ;;  %s927_s30 = smov 4  }
  0x17   :  { %26 = dma.hbm_to_vmem [thread:$0]  %s1041_s0, 1024, %s21_s24, [#allocation5], %s926_s29, %s926_s29, %s927_s30  }
  0x18   :  { %s928_s9 = smov [#allocation9]   ;;  %s929_s11 = smov [#allocation10]  }
  0x19   :  { %s42_s10 = sshll.u32 %s928_s9, 4  ;;  %s56_s12 = sshll.u32 %s929_s11, 4  ;;  %s43_s10 = int_to_ptr.vmem [resolvable:$true] %s42_s10  ;;  %s57_s12 = int_to_ptr.vmem [resolvable:$true] %s56_s12 }
  0x1a   :  { %s864_s1 = scalar_lea.vmem %s43_s10, 1024  ;;  %p869_p11 = scmp.lt.s32.totalorder %s43_s10, %s43_s10 }
  0x1b   :  { %p865_p10 = scmp.ne.s32.totalorder %s43_s10, %s864_s1  ;;  %p870_p12 = scmp.lt.s32.totalorder %s864_s1, %s864_s1 }
  0x1d   :  { %p871_p13 = por %p870_p12, %p869_p11 }
  0x1f   :  { %p872_p0 = pnand %p871_p13, %p865_p10 }
  0x21   :  { %875 = shalt.err (!%p872_p0)
}
  0x22   :  { %48 = dma.hbm_to_vmem [thread:$0]  %s1043_s2, 1024, %s43_s10, [#allocation8], %s926_s29, %s926_s29, %s927_s30  }
  0x23   :  { %s884_s15 = scalar_lea.vmem %s57_s12, 1024  ;;  %p889_p2 = scmp.lt.s32.totalorder %s57_s12, %s57_s12 }
  0x24   :  { %p885_p1 = scmp.ne.s32.totalorder %s57_s12, %s884_s15  ;;  %p890_p3 = scmp.lt.s32.totalorder %s884_s15, %s884_s15 }
  0x26   :  { %p891_p4 = por %p890_p3, %p889_p2 }
  0x28   :  { %p892_p5 = pnand %p891_p4, %p885_p1 }
  0x2a   :  { %895 = shalt.err (!%p892_p5)
}
  0x2b   :  { %62 = dma.hbm_to_vmem [thread:$0]  %s1045_s4, 1024, %s57_s12, [#allocation11], %s926_s29, %s926_s29, %s927_s30  }
  0x2c   :  { %916 = dma.done.wait [#allocation5], 1024  }
  0x2d   :  { %917 = vsyncadd [#allocation5], 4294966272 }
  0x2e   :  { %918 = dma.done.wait [#allocation8], 1088  }
  0x2f   :  { %919 = vsyncadd [#allocation8], 4294966208 }
  0x30   :  { %920 = dma.done.wait [#allocation11], 1024  }
  0x31   :  { %921 = vsyncadd [#allocation11], 4294966272  ;;  %v105_v0 = vlaneseq  ;;  %vm83_vm0 = vcmask 7168   ;;  %v930_v1 = vmov 0.0   ;;  %vm416_vm1 = vcmask 130048   ;;  %v794_v22 = vld [vmem:[#allocation9 + $0x38] sm:$0xff]  }
  0x32   :  { %84 = vst.msk [vmem:[#allocation3] sm:$0xff] %vm83_vm0, %v930_v1  ;;  %741 = vmatprep.subr.bf16.mxu0 %v930_v1  ;;  %761 = vmatprep.subr.bf16.mxu1 %v930_v1  ;;  %v85_v4 = vld [vmem:[#allocation7] sm:$0xf]  ;;  %v931_v18 = vmov 0   ;;  %v795_v23 = vld [vmem:[#allocation9 + $0x30] sm:$0xff]   ;;  %v796_v24 = vld [vmem:[#allocation9 + $0x28] sm:$0xff]  }
  0x33   :  { %v987_v2 = vshrl.u32 %v105_v0, 7  ;;  %v415_v5 = vunpack.c.l.bf16 %v85_v4  ;;  %v103_v6 = vpack.i.b16 %v85_v4, %v85_v4  ;;  %v112_v7 = vshrl.u32 %v85_v4, 16  ;;  %793 = vset.pattern.permute.xlu0 %v931_v18  ;;  %742 = vmatpush3.bf16.msra.mxu0 %v794_v22  ;;  %v797_v25 = vld [vmem:[#allocation9 + $0x20] sm:$0xff]   ;;  %v798_v26 = vld [vmem:[#allocation9 + $0x18] sm:$0xff]   ;;  %v799_v27 = vld [vmem:[#allocation9 + $0x10] sm:$0xff]   ;;  %s935_s18 = smov [#allocation12]  }
  0x34   :  { %743 = vmatprep.subr.bf16.mxu0 %v930_v1  ;;  %v800_v28 = vld [vmem:[#allocation9 + $0x8] sm:$0xff]   ;;  %v801_v34 = vld [vmem:[#allocation9] sm:$0xff]   ;;  %vm932_vm2 = vmmov 0   ;;  %v933_v38 = vmov 839922192   ;;  %vm397_vm3 = vcmask 1041409  }
  0x35   :  { %v124_v3 = vsub.s32 1, %v987_v2  ;;  %v138_v8 = vsub.s32 2, %v987_v2  ;;  %v417_v9 = vsel %vm416_vm1, %v415_v5, 0.0  ;;  %v113_v11 = vpack.i.b16 %v112_v7, %v112_v7  ;;  %757 = vmatprep.mubr.msk.bf16.mxu0 %vm932_vm2, %v930_v1  ;;  %777 = vmatprep.mubr.msk.bf16.mxu1 %vm932_vm2, %v930_v1  ;;  %v88_v49 = vld [vmem:[#allocation4 + $0x8] sm:$0xf]  ;;  %s694_s19 = sshll.u32 %s935_s18, 4  ;;  %s695_s19 = int_to_ptr.vmem [resolvable:$true] %s694_s19 }
  0x36   :  { %418 = vadd.xlane.f32.xlu0 %v417_v9  ;;  %v107_v13 = vsub.s32 0, %v987_v2  ;;  %v152_v17 = vsub.s32 3, %v987_v2  ;;  %v173_v39 = vunpack.c.l.s4 %v933_v38  ;;  %v934_v40 = vmov 1985246804   ;;  %v89_v54 = vld [vmem:[#allocation4 + $0xc] sm:$0xf]  ;;  %p901_p7 = scmp.lt.s32.totalorder %s695_s19, %s695_s19 }
  0x37   :  { %v125_v10 = vrot.slane %v103_v6, %v124_v3  ;;  %v139_v12 = vrot.slane %v103_v6, %v138_v8  ;;  %v132_v15 = vrot.slane %v113_v11, %v124_v3  ;;  %v146_v16 = vrot.slane %v113_v11, %v138_v8  ;;  %744 = vmatpush3.bf16.msra.mxu0 %v795_v23  ;;  %v86_v55 = vld [vmem:[#allocation4] sm:$0xf]  ;;  %v87_v56 = vld [vmem:[#allocation4 + $0x4] sm:$0xf]  ;;  %v90_v60 = vld [vmem:[#allocation4 + $0x10] sm:$0xf] }
  0x38   :  { %v118_v14 = vrot.slane %v113_v11, %v107_v13  ;;  %v153_v19 = vrot.slane %v103_v6, %v152_v17  ;;  %v108_v20 = vrot.slane %v103_v6, %v107_v13  ;;  %v160_v21 = vrot.slane %v113_v11, %v152_v17  ;;  %745 = vmatprep.subr.bf16.mxu0 %v930_v1  ;;  %v91_v61 = vld [vmem:[#allocation4 + $0x14] sm:$0xf]  ;;  %v92_v7 = vld [vmem:[#allocation4 + $0x18] sm:$0xf]  ;;  %v93_v8 = vld [vmem:[#allocation4 + $0x1c] sm:$0xf] }
  0x39   :  { %127 = vbcast.lane.c.b16.xlu1 %v125_v10, 256  ;;  %v414_v29 = vld [vmem:[#allocation3] sm:$0xff]  ;;  %v180_v41 = vunpack.c.l.s4 %v934_v40  ;;  %v174_v43 = vunpack.c.0.s8 %v173_v39  ;;  %v95_v17 = vld [vmem:[#allocation4 + $0x24] sm:$0xf]  ;;  %v98_v40 = vld [vmem:[#allocation4 + $0x30] sm:$0xf] }
  0x3a   :  { %vm399_vm4 = vcmask 1042434   ;;  %vm401_vm5 = vcmask 1043459   ;;  %vm403_vm6 = vcmask 1044484   ;;  %vm405_vm7 = vcmask 1045509   ;;  %s896_s20 = scalar_lea.vmem %s695_s19, 128 }
  0x3b   :  { %746 = vmatpush3.bf16.msra.mxu0 %v796_v24  ;;  %v181_v44 = vunpack.c.0.s8 %v180_v41  ;;  %v1004_v45 = vsub.s32 %v174_v43, %v987_v2  ;;  %v99_v41 = vld [vmem:[#allocation4 + $0x34] sm:$0xf]  ;;  %vm407_vm8 = vcmask 1046534   ;;  %vm409_vm9 = vcmask 1047559   ;;  %p897_p6 = scmp.ne.s32.totalorder %s695_s19, %s896_s20  ;;  %p902_p8 = scmp.lt.s32.totalorder %s896_s20, %s896_s20 }
  0x3c   :  { %747 = vmatprep.subr.bf16.mxu0 %v930_v1 }
  0x3d   :  { %141 = vbcast.lane.c.b16.xlu1 %v139_v12, 256  ;;  %v1007_v46 = vsub.s32 %v181_v44, %v987_v2  ;;  %p903_p9 = por %p902_p8, %p901_p7 }
  0x3f   :  { %748 = vmatpush3.bf16.msra.mxu0 %v797_v25  ;;  %p904_p10 = pnand %p903_p9, %p897_p6 }
  0x40   :  { %749 = vmatprep.subr.bf16.mxu0 %v930_v1 }
  0x41   :  { %120 = vbcast.lane.c.b16.xlu1 %v118_v14, 256 }
  0x43   :  { %750 = vmatpush3.bf16.msra.mxu0 %v798_v26 }
  0x44   :  { %751 = vmatprep.subr.bf16.mxu0 %v930_v1 }
  0x45   :  { %134 = vbcast.lane.c.b16.xlu1 %v132_v15, 256 }
  0x47   :  { %752 = vmatpush3.bf16.msra.mxu0 %v799_v27 }
  0x48   :  { %753 = vmatprep.subr.bf16.mxu0 %v930_v1 }
  0x49   :  { %148 = vbcast.lane.c.b16.xlu1 %v146_v16, 256  ;;  %v94_v16 = vld [vmem:[#allocation4 + $0x20] sm:$0xf] }
  0x4b   :  { %754 = vmatpush3.bf16.msra.mxu0 %v800_v28  ;;  %v96_v28 = vld [vmem:[#allocation4 + $0x28] sm:$0xf] }
  0x4c   :  { %110 = vbcast.lane.c.b16.xlu0 %v108_v20, 256  ;;  %755 = vmatprep.subr.bf16.mxu0 %v930_v1 }
  0x4d   :  { %155 = vbcast.lane.c.b16.xlu1 %v153_v19, 256 }
  0x4f   :  { %756 = vmatpush3.bf16.msra.mxu0 %v801_v34 }
  0x51   :  { %162 = vbcast.lane.c.b16.xlu1 %v160_v21, 256 }
  0xab   :  { %v128_v36 = vpop.permute.xlu1 %127 }
  0xac   :  { %v206_v57 = vrot.slane %v128_v36, %v1004_v45  ;;  %v213_v58 = vrot.slane %v128_v36, %v1007_v46 }
  0xae   :  { %v304_v5 = vmul.bf16 %v206_v57, %v90_v60  ;;  %v305_v6 = vmul.bf16 %v213_v58, %v91_v61 }
  0xaf   :  { %v142_v37 = vpop.permute.xlu1 %141 }
  0xb0   :  { %v234_v13 = vrot.slane %v142_v37, %v1004_v45  ;;  %v241_v14 = vrot.slane %v142_v37, %v1007_v46  ;;  %v321_v20 = vunpack.c.l.bf16 %v304_v5  ;;  %v322_v21 = vunpack.c.l.bf16 %v305_v6 }
  0xb2   :  { %v308_v26 = vmul.bf16 %v234_v13, %v94_v16  ;;  %v309_v27 = vmul.bf16 %v241_v14, %v95_v17 }
  0xb3   :  { %v121_v42 = vpop.permute.xlu1 %120 }
  0xb4   :  { %v192_v50 = vrot.slane %v121_v42, %v1004_v45  ;;  %v199_v51 = vrot.slane %v121_v42, %v1007_v46  ;;  %v325_v42 = vunpack.c.l.bf16 %v308_v26  ;;  %v326_v43 = vunpack.c.l.bf16 %v309_v27 }
  0xb6   :  { %v302_v62 = vmul.bf16 %v192_v50, %v88_v49  ;;  %v303_v63 = vmul.bf16 %v199_v51, %v89_v54  ;;  %v361_v58 = vadd.f32 %v326_v43, %v325_v42 }
  0xb7   :  { %v135_v47 = vpop.permute.xlu1 %134 }
  0xb8   :  { %v220_v3 = vrot.slane %v135_v47, %v1004_v45  ;;  %v227_v4 = vrot.slane %v135_v47, %v1007_v46  ;;  %v319_v9 = vunpack.c.l.bf16 %v302_v62  ;;  %v320_v10 = vunpack.c.l.bf16 %v303_v63 }
  0xba   :  { %v306_v18 = vmul.bf16 %v220_v3, %v92_v7  ;;  %v307_v19 = vmul.bf16 %v227_v4, %v93_v8  ;;  %v340_v22 = vadd.f32 %v320_v10, %v319_v9 }
  0xbb   :  { %v149_v59 = vpop.permute.xlu1 %148 }
  0xbc   :  { %v248_v23 = vrot.slane %v149_v59, %v1004_v45  ;;  %v255_v24 = vrot.slane %v149_v59, %v1007_v46  ;;  %v341_v36 = vrot.slane %v340_v22, 4 }
  0xbe   :  { %v310_v37 = vmul.bf16 %v248_v23, %v96_v28  ;;  %v342_v54 = vadd.f32 %v341_v36, %v340_v22 }
  0xbf   :  { %v419_v30 = vpop.xlane.xlu0 %418  ;;  %v156_v15 = vpop.permute.xlu1 %155 }
  0xc0   :  { %v420_v31 = vadd.f32 %v419_v30, %v414_v29  ;;  %v97_v29 = vld [vmem:[#allocation4 + $0x2c] sm:$0xf]  ;;  %v323_v30 = vunpack.c.l.bf16 %v306_v18  ;;  %v269_v34 = vrot.slane %v156_v15, %v1007_v46 }
  0xc1   :  { %v311_v38 = vmul.bf16 %v255_v24, %v97_v29 }
  0xc2   :  { %422 = vst.msk [vmem:[#allocation3] sm:$0xff] %vm83_vm0, %v420_v31  ;;  %v324_v31 = vunpack.c.l.bf16 %v307_v19  ;;  %v313_v51 = vmul.bf16 %v269_v34, %v99_v41 }
  0xc3   :  { %v111_v48 = vpop.permute.xlu0 %110 }
  0xc4   :  { %v178_v52 = vrot.slane %v111_v48, %v1004_v45  ;;  %v185_v53 = vrot.slane %v111_v48, %v1007_v46  ;;  %v354_v44 = vadd.f32 %v324_v31, %v323_v30 }
  0xc6   :  { %v300_v0 = vmul.bf16 %v178_v52, %v86_v55  ;;  %v301_v2 = vmul.bf16 %v185_v53, %v87_v56  ;;  %v100_v52 = vld [vmem:[#allocation4 + $0x38] sm:$0xf]  ;;  %v101_v53 = vld [vmem:[#allocation4 + $0x3c] sm:$0xf]  ;;  %v327_v55 = vunpack.c.l.bf16 %v310_v37  ;;  %v328_v56 = vunpack.c.l.bf16 %v311_v38 }
  0xc7   :  { %v355_v59 = vrot.slane %v354_v44, 4 }
  0xc8   :  { %v317_v11 = vunpack.c.l.bf16 %v300_v0  ;;  %v318_v12 = vunpack.c.l.bf16 %v301_v2  ;;  %v330_v0 = vunpack.c.l.bf16 %v313_v51  ;;  %v343_v2 = vrot.slane %v342_v54, 2 }
  0xc9   :  { %v426_v32 = vld [vmem:[#allocation3] sm:$0xff]  ;;  %v356_v4 = vadd.f32 %v355_v59, %v354_v44 }
  0xca   :  { %v427_v33 = vmax.f32 %v426_v32, 1.0  ;;  %v333_v25 = vadd.f32 %v318_v12, %v317_v11  ;;  %v347_v32 = vadd.f32 %v322_v21, %v321_v20  ;;  %v344_v9 = vadd.f32 %v343_v2, %v342_v54  ;;  %v803_v59 = vld [vmem:[#allocation10 + $0x30] sm:$0xff]   ;;  %v809_v2 = vld [vmem:[#allocation10] sm:$0xff]  }
  0xcb   :  { %v357_v13 = vrot.slane %v356_v4, 2 }
  0xcc   :  { %810 = vrcp.f32 %v427_v33  ;;  %v262_v33 = vrot.slane %v156_v15, %v1004_v45  ;;  %v334_v39 = vrot.slane %v333_v25, 4  ;;  %v348_v49 = vrot.slane %v347_v32, 4 }
  0xcd   :  { %v345_v17 = vrot.slane %v344_v9, 1  ;;  %v358_v21 = vadd.f32 %v357_v13, %v356_v4 }
  0xce   :  { %v312_v50 = vmul.bf16 %v262_v33, %v98_v40  ;;  %v335_v57 = vadd.f32 %v334_v39, %v333_v25  ;;  %v349_v62 = vadd.f32 %v348_v49, %v347_v32 }
  0xcf   :  { %v346_v25 = vadd.f32 %v345_v17, %v344_v9  ;;  %v359_v29 = vrot.slane %v358_v21, 1 }
  0xd0   :  { %v329_v63 = vunpack.c.l.bf16 %v312_v50  ;;  %v336_v3 = vrot.slane %v335_v57, 2  ;;  %v350_v7 = vrot.slane %v349_v62, 2 }
  0xd1   :  { %v360_v36 = vadd.f32 %v359_v29, %v358_v21 }
  0xd2   :  { %v375_v8 = vadd.f32 %v330_v0, %v329_v63  ;;  %v337_v11 = vadd.f32 %v336_v3, %v335_v57  ;;  %v351_v15 = vadd.f32 %v350_v7, %v349_v62  ;;  %v806_v62 = vld [vmem:[#allocation10 + $0x18] sm:$0xff]   ;;  %v807_v63 = vld [vmem:[#allocation10 + $0x10] sm:$0xff]   ;;  %v808_v0 = vld [vmem:[#allocation10 + $0x8] sm:$0xff]  }
  0xd4   :  { %v376_v16 = vrot.slane %v375_v8, 4  ;;  %v338_v19 = vrot.slane %v337_v11, 1  ;;  %v352_v23 = vrot.slane %v351_v15, 1 }
  0xd6   :  { %v377_v24 = vadd.f32 %v376_v16, %v375_v8  ;;  %v339_v27 = vadd.f32 %v338_v19, %v337_v11  ;;  %v353_v31 = vadd.f32 %v352_v23, %v351_v15 }
  0xd8   :  { %v378_v32 = vrot.slane %v377_v24, 2  ;;  %v398_v34 = vsel %vm397_vm3, %v346_v25, %v339_v27 }
  0xd9   :  { %v811_v35 = vpop.eup %810  ;;  %v400_v39 = vsel %vm399_vm4, %v353_v31, %v398_v34 }
  0xda   :  { %432 = vperm.xlu0 %793, %v811_v35   ;;  %v163_v35 = vpop.permute.xlu1 %162  ;;  %v379_v38 = vadd.f32 %v378_v32, %v377_v24  ;;  %v402_v43 = vsel %vm401_vm5, %v360_v36, %v400_v39  ;;  %v714_v32 = vld [vmem:[%s1046_s5] ss:$0 sm:$0xff] }
  0xdb   :  { %v276_v47 = vrot.slane %v163_v35, %v1004_v45  ;;  %v283_v48 = vrot.slane %v163_v35, %v1007_v46  ;;  %v368_v45 = vadd.f32 %v328_v56, %v327_v55  ;;  %v362_v46 = vrot.slane %v361_v58, 4 }
  0xdc   :  { %v380_v44 = vrot.slane %v379_v38, 1 }
  0xdd   :  { %v314_v60 = vmul.bf16 %v276_v47, %v100_v52  ;;  %v315_v61 = vmul.bf16 %v283_v48, %v101_v53  ;;  %v369_v10 = vrot.slane %v368_v45, 4  ;;  %v363_v12 = vadd.f32 %v362_v46, %v361_v58  ;;  %v802_v58 = vld [vmem:[#allocation10 + $0x38] sm:$0xff]  }
  0xde   :  { %v381_v50 = vadd.f32 %v380_v44, %v379_v38  ;;  %762 = vmatpush3.bf16.msra.mxu1 %v802_v58 }
  0xdf   :  { %v331_v5 = vunpack.c.l.bf16 %v314_v60  ;;  %v332_v6 = vunpack.c.l.bf16 %v315_v61  ;;  %v370_v18 = vadd.f32 %v369_v10, %v368_v45  ;;  %v364_v20 = vrot.slane %v363_v12, 2  ;;  %763 = vmatprep.subr.bf16.mxu1 %v930_v1  ;;  %v804_v60 = vld [vmem:[#allocation10 + $0x28] sm:$0xff]   ;;  %v805_v61 = vld [vmem:[#allocation10 + $0x20] sm:$0xff]   ;;  %v705_v45 = vld [vmem:[%s1044_s3] ss:$0 sm:$0xff] }
  0xe1   :  { %v382_v14 = vadd.f32 %v332_v6, %v331_v5  ;;  %v371_v26 = vrot.slane %v370_v18, 2  ;;  %v365_v28 = vadd.f32 %v364_v20, %v363_v12 }
  0xe2   :  { %764 = vmatpush3.bf16.msra.mxu1 %v803_v59 }
  0xe3   :  { %v383_v22 = vrot.slane %v382_v14, 4  ;;  %v372_v33 = vadd.f32 %v371_v26, %v370_v18  ;;  %v366_v35 = vrot.slane %v365_v28, 1  ;;  %765 = vmatprep.subr.bf16.mxu1 %v930_v1 }
  0xe5   :  { %v384_v30 = vadd.f32 %v383_v22, %v382_v14  ;;  %v373_v40 = vrot.slane %v372_v33, 1  ;;  %v367_v41 = vadd.f32 %v366_v35, %v365_v28 }
  0xe6   :  { %766 = vmatpush3.bf16.msra.mxu1 %v804_v60 }
  0xe7   :  { %v385_v37 = vrot.slane %v384_v30, 2  ;;  %v374_v47 = vadd.f32 %v373_v40, %v372_v33  ;;  %v404_v48 = vsel %vm403_vm6, %v367_v41, %v402_v43  ;;  %767 = vmatprep.subr.bf16.mxu1 %v930_v1 }
  0xe9   :  { %v386_v42 = vadd.f32 %v385_v37, %v384_v30  ;;  %v406_v51 = vsel %vm405_vm7, %v374_v47, %v404_v48 }
  0xea   :  { %v408_v53 = vsel %vm407_vm8, %v381_v50, %v406_v51  ;;  %768 = vmatpush3.bf16.msra.mxu1 %v805_v61 }
  0xeb   :  { %v387_v49 = vrot.slane %v386_v42, 1  ;;  %769 = vmatprep.subr.bf16.mxu1 %v930_v1 }
  0xed   :  { %v388_v52 = vadd.f32 %v387_v49, %v386_v42 }
  0xee   :  { %770 = vmatpush3.bf16.msra.mxu1 %v806_v62 }
  0xef   :  { %v410_v54 = vsel %vm409_vm9, %v388_v52, %v408_v53  ;;  %771 = vmatprep.subr.bf16.mxu1 %v930_v1 }
  0xf2   :  { %772 = vmatpush3.bf16.msra.mxu1 %v807_v63 }
  0xf3   :  { %773 = vmatprep.subr.bf16.mxu1 %v930_v1 }
  0xf6   :  { %774 = vmatpush3.bf16.msra.mxu1 %v808_v0 }
  0xf7   :  { %775 = vmatprep.subr.bf16.mxu1 %v930_v1 }
  0xfa   :  { %776 = vmatpush3.bf16.msra.mxu1 %v809_v2 }
 0x155   :  { %v433_v55 = vpop.permute.xlu0 %432 }
 0x156   :  { %v435_v56 = vmul.f32 %v433_v55, %v410_v54 }
 0x158   :  { %v436_v57 = vpack.c.bf16 %v435_v56, %v435_v56 }
 0x15a   :  { %758 = vmatmul.mubr.bf16.vlgmr.msra.gmra.mxu0 %v436_v57 }
 0x21a   :  { %v542_v3 = vpop.f32.mrf.mxu0 }
 0x21b   :  { %v543_v46 = vadd.f32 %v705_v45, %v542_v3 }
 0x21c   :  { %v759_v4 = vpop.f32.mrf.mxu0 }
 0x21d   :  { %v549_v5 = vmul.f32 0.70710677, %v543_v46  ;;  %v548_v28 = vmul.f32 0.5, %v543_v46 }
 0x21e   :  { %v545_v6 = vpop.f32.mrf.mxu0 }
 0x21f   :  { %v550_v7 = vand.u32 2147483647, %v549_v5  ;;  %vm570_vm10 = vcmp.lt.f32.partialorder %v549_v5, 0.0 }
 0x220   :  { %v760_v8 = vpop.f32.mrf.mxu0 }
 0x221   :  { %v551_v9 = vmul.f32 0.3275911, %v550_v7  ;;  %v564_v11 = vsub.f32 0.0, %v550_v7 }
 0x223   :  { %v552_v10 = vadd.f32 1.0, %v551_v9  ;;  %v565_v12 = vmul.f32 %v564_v11, %v550_v7 }
 0x225   :  { %812 = vrcp.f32 %v552_v10  ;;  %v566_v14 = vmul.f32 1.442695, %v565_v12 }
 0x227   :  { %814 = vpow2.f32 %v566_v14 }
 0x232   :  { %v813_v13 = vpop.eup %812 }
 0x233   :  { %v555_v1 = vmul.f32 1.0614054, %v813_v13 }
 0x234   :  { %v815_v23 = vpop.eup %814 }
 0x235   :  { %v556_v15 = vadd.f32 -1.4531521, %v555_v1 }
 0x237   :  { %v557_v16 = vmul.f32 %v813_v13, %v556_v15 }
 0x239   :  { %v558_v17 = vadd.f32 1.4214138, %v557_v16 }
 0x23b   :  { %v559_v18 = vmul.f32 %v813_v13, %v558_v17 }
 0x23d   :  { %v560_v19 = vadd.f32 -0.28449672, %v559_v18 }
 0x23f   :  { %v561_v20 = vmul.f32 %v813_v13, %v560_v19 }
 0x241   :  { %v562_v21 = vadd.f32 0.2548296, %v561_v20 }
 0x243   :  { %v563_v22 = vmul.f32 %v813_v13, %v562_v21 }
 0x245   :  { %v568_v24 = vmul.f32 %v815_v23, %v563_v22 }
 0x247   :  { %v569_v25 = vsub.f32 1.0, %v568_v24 }
 0x249   :  { %v571_v26 = vsub.f32 0.0, %v569_v25 }
 0x24b   :  { %v572_v27 = vsel %vm570_vm10, %v571_v26, %v569_v25 }
 0x24c   :  { %v573_v29 = vadd.f32 1.0, %v572_v27 }
 0x24e   :  { %v574_v30 = vmul.f32 %v573_v29, %v548_v28 }
 0x250   :  { %v575_v31 = vpack.c.bf16 %v574_v30, %v574_v30 }
 0x252   :  { %778 = vmatmul.mubr.bf16.vlgmr.msra.gmra.mxu1 %v575_v31 }
 0x312   :  { %v681_v33 = vpop.f32.mrf.mxu1 }
 0x313   :  { %v682_v34 = vadd.f32 %v714_v32, %v681_v33 }
 0x314   :  { %v779_v35 = vpop.f32.mrf.mxu1 }
 0x315   :  { %687 = vst [vmem:[#allocation12] sm:$0xff] %v682_v34 }
 0x316   :  { %v684_v36 = vpop.f32.mrf.mxu1 }
 0x317   :  { %907 = shalt.err (!%p904_p10)
}
 0x318   :  { %697 = dma.vmem_to_hbm [thread:$0]  %s695_s19, 128, %s1047_s6, [#allocation6]   ;;  %v780_v37 = vpop.f32.mrf.mxu1 }
 0x319   :  { %922 = dma.done.wait [#allocation6], 128  }
 0x31a   :  { %923 = vsyncadd [#allocation6], 4294967168 }
 0x31b   :  { %701 = vsyncpa [#allocation5], 1 }
 0x31c   :  { %702 = vsyncpa [#allocation8], 1 }
 0x31d   :  { %703 = vsyncpa [#allocation11], 1 }
 0x31e   :  { %704 = vsyncpa [#allocation6], 1 }

// kernel: tpu_custom_call.1
= control target key start
LH: loop header
LB: loop body
LE: loop exit
PB: predicated region body
PF: predicated region fallthrough
CT: control target
= control target key end

     0   :  { %11 = vsyncpa [#allocation5], 0  ;;  %s1041_s0 = inlined_call_operand.hbm [shape: bf16[8,16,128], index: 0, kind: input, shape index: {}]   ;;  %s1042_s1 = inlined_call_operand.hbm [shape: bf16[8,16], index: 1, kind: input, shape index: {}]   ;;  %s1043_s2 = inlined_call_operand.hbm [shape: bf16[128,128], index: 2, kind: input, shape index: {}]   ;;  %s1044_s3 = inlined_call_operand.vmem [shape: f32[1,128], index: 3, kind: input, shape index: {}]   ;;  %s1045_s4 = inlined_call_operand.hbm [shape: bf16[128,128], index: 4, kind: input, shape index: {}]   ;;  %s1046_s5 = inlined_call_operand.vmem [shape: f32[1,128], index: 5, kind: input, shape index: {}]   ;;  %s1047_s6 = inlined_call_operand.hbm [shape: f32[8,128], index: 6, kind: output, shape index: {}]  }
   0x1   :  { %12 = vsyncpa [#allocation8], 0 }
   0x2   :  { %13 = vsyncpa [#allocation11], 0 }
   0x3   :  { %14 = vsyncpa [#allocation6], 0  ;;  %s924_s21 = smov [#allocation7]   ;;  %s925_s23 = smov [#allocation4]  }
   0x4   :  { %s33_s22 = sshll.u32 %s924_s21, 4  ;;  %s20_s24 = sshll.u32 %s925_s23, 4  ;;  %s34_s22 = int_to_ptr.vmem [resolvable:$true] %s33_s22  ;;  %s21_s24 = int_to_ptr.vmem [resolvable:$true] %s20_s24 }
   0x5   :  { %s824_s25 = scalar_lea.vmem %s34_s22, 64  ;;  %p829_p1 = scmp.lt.s32.totalorder %s34_s22, %s34_s22 }
   0x6   :  { %p825_p0 = scmp.ne.s32.totalorder %s34_s22, %s824_s25  ;;  %p830_p2 = scmp.lt.s32.totalorder %s824_s25, %s824_s25 }
   0x8   :  { %p831_p3 = por %p830_p2, %p829_p1 }
   0xa   :  { %p832_p4 = pnand %p831_p3, %p825_p0 }
   0xc   :  { %835 = shalt.err (!%p832_p4)
}
   0xd   :  { %36 = dma.hbm_to_vmem [thread:$0]  %s1042_s1, 64, %s34_s22, [#allocation8]  }
   0xe   :  { %s844_s28 = scalar_lea.vmem %s21_s24, 1024  ;;  %p849_p6 = scmp.lt.s32.totalorder %s21_s24, %s21_s24 }
   0xf   :  { %p845_p5 = scmp.ne.s32.totalorder %s21_s24, %s844_s28  ;;  %p850_p7 = scmp.lt.s32.totalorder %s844_s28, %s844_s28 }
  0x11   :  { %p851_p8 = por %p850_p7, %p849_p6 }
  0x13   :  { %p852_p9 = pnand %p851_p8, %p845_p5 }
  0x15   :  { %855 = shalt.err (!%p852_p9)
}
  0x16   :  { %s926_s29 = smov 64   ;;  %s927_s30 = smov 4  }
  0x17   :  { %26 = dma.hbm_to_vmem [thread:$0]  %s1041_s0, 1024, %s21_s24, [#allocation5], %s926_s29, %s926_s29, %s927_s30  }
  0x18   :  { %s928_s9 = smov [#allocation9]   ;;  %s929_s11 = smov [#allocation10]  }
  0x19   :  { %s42_s10 = sshll.u32 %s928_s9, 4  ;;  %s56_s12 = sshll.u32 %s929_s11, 4  ;;  %s43_s10 = int_to_ptr.vmem [resolvable:$true] %s42_s10  ;;  %s57_s12 = int_to_ptr.vmem [resolvable:$true] %s56_s12 }
  0x1a   :  { %s864_s1 = scalar_lea.vmem %s43_s10, 1024  ;;  %p869_p11 = scmp.lt.s32.totalorder %s43_s10, %s43_s10 }
  0x1b   :  { %p865_p10 = scmp.ne.s32.totalorder %s43_s10, %s864_s1  ;;  %p870_p12 = scmp.lt.s32.totalorder %s864_s1, %s864_s1 }
  0x1d   :  { %p871_p13 = por %p870_p12, %p869_p11 }
  0x1f   :  { %p872_p0 = pnand %p871_p13, %p865_p10 }
  0x21   :  { %875 = shalt.err (!%p872_p0)
}
  0x22   :  { %48 = dma.hbm_to_vmem [thread:$0]  %s1043_s2, 1024, %s43_s10, [#allocation8], %s926_s29, %s926_s29, %s927_s30  }
  0x23   :  { %s884_s15 = scalar_lea.vmem %s57_s12, 1024  ;;  %p889_p2 = scmp.lt.s32.totalorder %s57_s12, %s57_s12 }
  0x24   :  { %p885_p1 = scmp.ne.s32.totalorder %s57_s12, %s884_s15  ;;  %p890_p3 = scmp.lt.s32.totalorder %s884_s15, %s884_s15 }
  0x26   :  { %p891_p4 = por %p890_p3, %p889_p2 }
  0x28   :  { %p892_p5 = pnand %p891_p4, %p885_p1 }
  0x2a   :  { %895 = shalt.err (!%p892_p5)
}
  0x2b   :  { %62 = dma.hbm_to_vmem [thread:$0]  %s1045_s4, 1024, %s57_s12, [#allocation11], %s926_s29, %s926_s29, %s927_s30  }
  0x2c   :  { %916 = dma.done.wait [#allocation5], 1024  }
  0x2d   :  { %917 = vsyncadd [#allocation5], 4294966272 }
  0x2e   :  { %918 = dma.done.wait [#allocation8], 1088  }
  0x2f   :  { %919 = vsyncadd [#allocation8], 4294966208 }
  0x30   :  { %920 = dma.done.wait [#allocation11], 1024  }
  0x31   :  { %921 = vsyncadd [#allocation11], 4294966272  ;;  %v105_v0 = vlaneseq  ;;  %vm83_vm0 = vcmask 7168   ;;  %v930_v1 = vmov 0.0   ;;  %vm416_vm1 = vcmask 130048   ;;  %v794_v22 = vld [vmem:[#allocation9 + $0x38] sm:$0xff]  }
  0x32   :  { %84 = vst.msk [vmem:[#allocation3] sm:$0xff] %vm83_vm0, %v930_v1  ;;  %741 = vmatprep.subr.bf16.mxu0 %v930_v1  ;;  %761 = vmatprep.subr.bf16.mxu1 %v930_v1  ;;  %v85_v4 = vld [vmem:[#allocation7] sm:$0xf]  ;;  %v931_v18 = vmov 0   ;;  %v795_v23 = vld [vmem:[#allocation9 + $0x30] sm:$0xff]   ;;  %v796_v24 = vld [vmem:[#allocation9 + $0x28] sm:$0xff]  }
  0x33   :  { %v987_v2 = vshrl.u32 %v105_v0, 7  ;;  %v415_v5 = vunpack.c.l.bf16 %v85_v4  ;;  %v103_v6 = vpack.i.b16 %v85_v4, %v85_v4  ;;  %v112_v7 = vshrl.u32 %v85_v4, 16  ;;  %793 = vset.pattern.permute.xlu0 %v931_v18  ;;  %742 = vmatpush3.bf16.msra.mxu0 %v794_v22  ;;  %v797_v25 = vld [vmem:[#allocation9 + $0x20] sm:$0xff]   ;;  %v798_v26 = vld [vmem:[#allocation9 + $0x18] sm:$0xff]   ;;  %v799_v27 = vld [vmem:[#allocation9 + $0x10] sm:$0xff]   ;;  %s935_s18 = smov [#allocation12]  }
  0x34   :  { %743 = vmatprep.subr.bf16.mxu0 %v930_v1  ;;  %v800_v28 = vld [vmem:[#allocation9 + $0x8] sm:$0xff]   ;;  %v801_v34 = vld [vmem:[#allocation9] sm:$0xff]   ;;  %vm932_vm2 = vmmov 0   ;;  %v933_v38 = vmov 839922192   ;;  %vm397_vm3 = vcmask 1041409  }
  0x35   :  { %v124_v3 = vsub.s32 1, %v987_v2  ;;  %v138_v8 = vsub.s32 2, %v987_v2  ;;  %v417_v9 = vsel %vm416_vm1, %v415_v5, 0.0  ;;  %v113_v11 = vpack.i.b16 %v112_v7, %v112_v7  ;;  %757 = vmatprep.mubr.msk.bf16.mxu0 %vm932_vm2, %v930_v1  ;;  %777 = vmatprep.mubr.msk.bf16.mxu1 %vm932_vm2, %v930_v1  ;;  %v88_v49 = vld [vmem:[#allocation4 + $0x8] sm:$0xf]  ;;  %s694_s19 = sshll.u32 %s935_s18, 4  ;;  %s695_s19 = int_to_ptr.vmem [resolvable:$true] %s694_s19 }
  0x36   :  { %418 = vadd.xlane.f32.xlu0 %v417_v9  ;;  %v107_v13 = vsub.s32 0, %v987_v2  ;;  %v152_v17 = vsub.s32 3, %v987_v2  ;;  %v173_v39 = vunpack.c.l.s4 %v933_v38  ;;  %v934_v40 = vmov 1985246804   ;;  %v89_v54 = vld [vmem:[#allocation4 + $0xc] sm:$0xf]  ;;  %p901_p7 = scmp.lt.s32.totalorder %s695_s19, %s695_s19 }
  0x37   :  { %v125_v10 = vrot.slane %v103_v6, %v124_v3  ;;  %v139_v12 = vrot.slane %v103_v6, %v138_v8  ;;  %v132_v15 = vrot.slane %v113_v11, %v124_v3  ;;  %v146_v16 = vrot.slane %v113_v11, %v138_v8  ;;  %744 = vmatpush3.bf16.msra.mxu0 %v795_v23  ;;  %v86_v55 = vld [vmem:[#allocation4] sm:$0xf]  ;;  %v87_v56 = vld [vmem:[#allocation4 + $0x4] sm:$0xf]  ;;  %v90_v60 = vld [vmem:[#allocation4 + $0x10] sm:$0xf] }
  0x38   :  { %v118_v14 = vrot.slane %v113_v11, %v107_v13  ;;  %v153_v19 = vrot.slane %v103_v6, %v152_v17  ;;  %v108_v20 = vrot.slane %v103_v6, %v107_v13  ;;  %v160_v21 = vrot.slane %v113_v11, %v152_v17  ;;  %745 = vmatprep.subr.bf16.mxu0 %v930_v1  ;;  %v91_v61 = vld [vmem:[#allocation4 + $0x14] sm:$0xf]  ;;  %v92_v7 = vld [vmem:[#allocation4 + $0x18] sm:$0xf]  ;;  %v93_v8 = vld [vmem:[#allocation4 + $0x1c] sm:$0xf] }
  0x39   :  { %127 = vbcast.lane.c.b16.xlu1 %v125_v10, 256  ;;  %v414_v29 = vld [vmem:[#allocation3] sm:$0xff]  ;;  %v180_v41 = vunpack.c.l.s4 %v934_v40  ;;  %v174_v43 = vunpack.c.0.s8 %v173_v39  ;;  %v95_v17 = vld [vmem:[#allocation4 + $0x24] sm:$0xf]  ;;  %v98_v40 = vld [vmem:[#allocation4 + $0x30] sm:$0xf] }
  0x3a   :  { %vm399_vm4 = vcmask 1042434   ;;  %vm401_vm5 = vcmask 1043459   ;;  %vm403_vm6 = vcmask 1044484   ;;  %vm405_vm7 = vcmask 1045509   ;;  %s896_s20 = scalar_lea.vmem %s695_s19, 128 }
  0x3b   :  { %746 = vmatpush3.bf16.msra.mxu0 %v796_v24  ;;  %v181_v44 = vunpack.c.0.s8 %v180_v41  ;;  %v1004_v45 = vsub.s32 %v174_v43, %v987_v2  ;;  %v99_v41 = vld [vmem:[#allocation4 + $0x34] sm:$0xf]  ;;  %vm407_vm8 = vcmask 1046534   ;;  %vm409_vm9 = vcmask 1047559   ;;  %p897_p6 = scmp.ne.s32.totalorder %s695_s19, %s896_s20  ;;  %p902_p8 = scmp.lt.s32.totalorder %s896_s20, %s896_s20 }
  0x3c   :  { %747 = vmatprep.subr.bf16.mxu0 %v930_v1 }
  0x3d   :  { %141 = vbcast.lane.c.b16.xlu1 %v139_v12, 256  ;;  %v1007_v46 = vsub.s32 %v181_v44, %v987_v2  ;;  %p903_p9 = por %p902_p8, %p901_p7 }
  0x3f   :  { %748 = vmatpush3.bf16.msra.mxu0 %v797_v25  ;;  %p904_p10 = pnand %p903_p9, %p897_p6 }
  0x40   :  { %749 = vmatprep.subr.bf16.mxu0 %v930_v1 }
  0x41   :  { %120 = vbcast.lane.c.b16.xlu1 %v118_v14, 256 }
  0x43   :  { %750 = vmatpush3.bf16.msra.mxu0 %v798_v26 }
  0x44   :  { %751 = vmatprep.subr.bf16.mxu0 %v930_v1 }
  0x45   :  { %134 = vbcast.lane.c.b16.xlu1 %v132_v15, 256 }
  0x47   :  { %752 = vmatpush3.bf16.msra.mxu0 %v799_v27 }
  0x48   :  { %753 = vmatprep.subr.bf16.mxu0 %v930_v1 }
  0x49   :  { %148 = vbcast.lane.c.b16.xlu1 %v146_v16, 256  ;;  %v94_v16 = vld [vmem:[#allocation4 + $0x20] sm:$0xf] }
  0x4b   :  { %754 = vmatpush3.bf16.msra.mxu0 %v800_v28  ;;  %v96_v28 = vld [vmem:[#allocation4 + $0x28] sm:$0xf] }
  0x4c   :  { %110 = vbcast.lane.c.b16.xlu0 %v108_v20, 256  ;;  %755 = vmatprep.subr.bf16.mxu0 %v930_v1 }
  0x4d   :  { %155 = vbcast.lane.c.b16.xlu1 %v153_v19, 256 }
  0x4f   :  { %756 = vmatpush3.bf16.msra.mxu0 %v801_v34 }
  0x51   :  { %162 = vbcast.lane.c.b16.xlu1 %v160_v21, 256 }
  0xab   :  { %v128_v36 = vpop.permute.xlu1 %127 }
  0xac   :  { %v206_v57 = vrot.slane %v128_v36, %v1004_v45  ;;  %v213_v58 = vrot.slane %v128_v36, %v1007_v46 }
  0xae   :  { %v304_v5 = vmul.bf16 %v206_v57, %v90_v60  ;;  %v305_v6 = vmul.bf16 %v213_v58, %v91_v61 }
  0xaf   :  { %v142_v37 = vpop.permute.xlu1 %141 }
  0xb0   :  { %v234_v13 = vrot.slane %v142_v37, %v1004_v45  ;;  %v241_v14 = vrot.slane %v142_v37, %v1007_v46  ;;  %v321_v20 = vunpack.c.l.bf16 %v304_v5  ;;  %v322_v21 = vunpack.c.l.bf16 %v305_v6 }
  0xb2   :  { %v308_v26 = vmul.bf16 %v234_v13, %v94_v16  ;;  %v309_v27 = vmul.bf16 %v241_v14, %v95_v17 }
  0xb3   :  { %v121_v42 = vpop.permute.xlu1 %120 }
  0xb4   :  { %v192_v50 = vrot.slane %v121_v42, %v1004_v45  ;;  %v199_v51 = vrot.slane %v121_v42, %v1007_v46  ;;  %v325_v42 = vunpack.c.l.bf16 %v308_v26  ;;  %v326_v43 = vunpack.c.l.bf16 %v309_v27 }
  0xb6   :  { %v302_v62 = vmul.bf16 %v192_v50, %v88_v49  ;;  %v303_v63 = vmul.bf16 %v199_v51, %v89_v54  ;;  %v361_v58 = vadd.f32 %v326_v43, %v325_v42 }
  0xb7   :  { %v135_v47 = vpop.permute.xlu1 %134 }
  0xb8   :  { %v220_v3 = vrot.slane %v135_v47, %v1004_v45  ;;  %v227_v4 = vrot.slane %v135_v47, %v1007_v46  ;;  %v319_v9 = vunpack.c.l.bf16 %v302_v62  ;;  %v320_v10 = vunpack.c.l.bf16 %v303_v63 }
  0xba   :  { %v306_v18 = vmul.bf16 %v220_v3, %v92_v7  ;;  %v307_v19 = vmul.bf16 %v227_v4, %v93_v8  ;;  %v340_v22 = vadd.f32 %v320_v10, %v319_v9 }
  0xbb   :  { %v149_v59 = vpop.permute.xlu1 %148 }
  0xbc   :  { %v248_v23 = vrot.slane %v149_v59, %v1004_v45  ;;  %v255_v24 = vrot.slane %v149_v59, %v1007_v46  ;;  %v341_v36 = vrot.slane %v340_v22, 4 }
  0xbe   :  { %v310_v37 = vmul.bf16 %v248_v23, %v96_v28  ;;  %v342_v54 = vadd.f32 %v341_v36, %v340_v22 }
  0xbf   :  { %v419_v30 = vpop.xlane.xlu0 %418  ;;  %v156_v15 = vpop.permute.xlu1 %155 }
  0xc0   :  { %v420_v31 = vadd.f32 %v419_v30, %v414_v29  ;;  %v97_v29 = vld [vmem:[#allocation4 + $0x2c] sm:$0xf]  ;;  %v323_v30 = vunpack.c.l.bf16 %v306_v18  ;;  %v269_v34 = vrot.slane %v156_v15, %v1007_v46 }
  0xc1   :  { %v311_v38 = vmul.bf16 %v255_v24, %v97_v29 }
  0xc2   :  { %422 = vst.msk [vmem:[#allocation3] sm:$0xff] %vm83_vm0, %v420_v31  ;;  %v324_v31 = vunpack.c.l.bf16 %v307_v19  ;;  %v313_v51 = vmul.bf16 %v269_v34, %v99_v41 }
  0xc3   :  { %v111_v48 = vpop.permute.xlu0 %110 }
  0xc4   :  { %v178_v52 = vrot.slane %v111_v48, %v1004_v45  ;;  %v185_v53 = vrot.slane %v111_v48, %v1007_v46  ;;  %v354_v44 = vadd.f32 %v324_v31, %v323_v30 }
  0xc6   :  { %v300_v0 = vmul.bf16 %v178_v52, %v86_v55  ;;  %v301_v2 = vmul.bf16 %v185_v53, %v87_v56  ;;  %v100_v52 = vld [vmem:[#allocation4 + $0x38] sm:$0xf]  ;;  %v101_v53 = vld [vmem:[#allocation4 + $0x3c] sm:$0xf]  ;;  %v327_v55 = vunpack.c.l.bf16 %v310_v37  ;;  %v328_v56 = vunpack.c.l.bf16 %v311_v38 }
  0xc7   :  { %v355_v59 = vrot.slane %v354_v44, 4 }
  0xc8   :  { %v317_v11 = vunpack.c.l.bf16 %v300_v0  ;;  %v318_v12 = vunpack.c.l.bf16 %v301_v2  ;;  %v330_v0 = vunpack.c.l.bf16 %v313_v51  ;;  %v343_v2 = vrot.slane %v342_v54, 2 }
  0xc9   :  { %v426_v32 = vld [vmem:[#allocation3] sm:$0xff]  ;;  %v356_v4 = vadd.f32 %v355_v59, %v354_v44 }
  0xca   :  { %v427_v33 = vmax.f32 %v426_v32, 1.0  ;;  %v333_v25 = vadd.f32 %v318_v12, %v317_v11  ;;  %v347_v32 = vadd.f32 %v322_v21, %v321_v20  ;;  %v344_v9 = vadd.f32 %v343_v2, %v342_v54  ;;  %v803_v59 = vld [vmem:[#allocation10 + $0x30] sm:$0xff]   ;;  %v809_v2 = vld [vmem:[#allocation10] sm:$0xff]  }
  0xcb   :  { %v357_v13 = vrot.slane %v356_v4, 2 }
  0xcc   :  { %810 = vrcp.f32 %v427_v33  ;;  %v262_v33 = vrot.slane %v156_v15, %v1004_v45  ;;  %v334_v39 = vrot.slane %v333_v25, 4  ;;  %v348_v49 = vrot.slane %v347_v32, 4 }
  0xcd   :  { %v345_v17 = vrot.slane %v344_v9, 1  ;;  %v358_v21 = vadd.f32 %v357_v13, %v356_v4 }
  0xce   :  { %v312_v50 = vmul.bf16 %v262_v33, %v98_v40  ;;  %v335_v57 = vadd.f32 %v334_v39, %v333_v25  ;;  %v349_v62 = vadd.f32 %v348_v49, %v347_v32 }
  0xcf   :  { %v346_v25 = vadd.f32 %v345_v17, %v344_v9  ;;  %v359_v29 = vrot.slane %v358_v21, 1 }
  0xd0   :  { %v329_v63 = vunpack.c.l.bf16 %v312_v50  ;;  %v336_v3 = vrot.slane %v335_v57, 2  ;;  %v350_v7 = vrot.slane %v349_v62, 2 }
  0xd1   :  { %v360_v36 = vadd.f32 %v359_v29, %v358_v21 }
  0xd2   :  { %v375_v8 = vadd.f32 %v330_v0, %v329_v63  ;;  %v337_v11 = vadd.f32 %v336_v3, %v335_v57  ;;  %v351_v15 = vadd.f32 %v350_v7, %v349_v62  ;;  %v806_v62 = vld [vmem:[#allocation10 + $0x18] sm:$0xff]   ;;  %v807_v63 = vld [vmem:[#allocation10 + $0x10] sm:$0xff]   ;;  %v808_v0 = vld [vmem:[#allocation10 + $0x8] sm:$0xff]  }
  0xd4   :  { %v376_v16 = vrot.slane %v375_v8, 4  ;;  %v338_v19 = vrot.slane %v337_v11, 1  ;;  %v352_v23 = vrot.slane %v351_v15, 1 }
  0xd6   :  { %v377_v24 = vadd.f32 %v376_v16, %v375_v8  ;;  %v339_v27 = vadd.f32 %v338_v19, %v337_v11  ;;  %v353_v31 = vadd.f32 %v352_v23, %v351_v15 }
  0xd8   :  { %v378_v32 = vrot.slane %v377_v24, 2  ;;  %v398_v34 = vsel %vm397_vm3, %v346_v25, %v339_v27 }
  0xd9   :  { %v811_v35 = vpop.eup %810  ;;  %v400_v39 = vsel %vm399_vm4, %v353_v31, %v398_v34 }
  0xda   :  { %432 = vperm.xlu0 %793, %v811_v35   ;;  %v163_v35 = vpop.permute.xlu1 %162  ;;  %v379_v38 = vadd.f32 %v378_v32, %v377_v24  ;;  %v402_v43 = vsel %vm401_vm5, %v360_v36, %v400_v39  ;;  %v714_v32 = vld [vmem:[%s1046_s5] ss:$0 sm:$0xff] }
  0xdb   :  { %v276_v47 = vrot.slane %v163_v35, %v1004_v45  ;;  %v283_v48 = vrot.slane %v163_v35, %v1007_v46  ;;  %v368_v45 = vadd.f32 %v328_v56, %v327_v55  ;;  %v362_v46 = vrot.slane %v361_v58, 4 }
  0xdc   :  { %v380_v44 = vrot.slane %v379_v38, 1 }
  0xdd   :  { %v314_v60 = vmul.bf16 %v276_v47, %v100_v52  ;;  %v315_v61 = vmul.bf16 %v283_v48, %v101_v53  ;;  %v369_v10 = vrot.slane %v368_v45, 4  ;;  %v363_v12 = vadd.f32 %v362_v46, %v361_v58  ;;  %v802_v58 = vld [vmem:[#allocation10 + $0x38] sm:$0xff]  }
  0xde   :  { %v381_v50 = vadd.f32 %v380_v44, %v379_v38  ;;  %762 = vmatpush3.bf16.msra.mxu1 %v802_v58 }
  0xdf   :  { %v331_v5 = vunpack.c.l.bf16 %v314_v60  ;;  %v332_v6 = vunpack.c.l.bf16 %v315_v61  ;;  %v370_v18 = vadd.f32 %v369_v10, %v368_v45  ;;  %v364_v20 = vrot.slane %v363_v12, 2  ;;  %763 = vmatprep.subr.bf16.mxu1 %v930_v1  ;;  %v804_v60 = vld [vmem:[#allocation10 + $0x28] sm:$0xff]   ;;  %v805_v61 = vld [vmem:[#allocation10 + $0x20] sm:$0xff]   ;;  %v705_v45 = vld [vmem:[%s1044_s3] ss:$0 sm:$0xff] }
  0xe1   :  { %v382_v14 = vadd.f32 %v332_v6, %v331_v5  ;;  %v371_v26 = vrot.slane %v370_v18, 2  ;;  %v365_v28 = vadd.f32 %v364_v20, %v363_v12 }
  0xe2   :  { %764 = vmatpush3.bf16.msra.mxu1 %v803_v59 }
  0xe3   :  { %v383_v22 = vrot.slane %v382_v14, 4  ;;  %v372_v33 = vadd.f32 %v371_v26, %v370_v18  ;;  %v366_v35 = vrot.slane %v365_v28, 1  ;;  %765 = vmatprep.subr.bf16.mxu1 %v930_v1 }
  0xe5   :  { %v384_v30 = vadd.f32 %v383_v22, %v382_v14  ;;  %v373_v40 = vrot.slane %v372_v33, 1  ;;  %v367_v41 = vadd.f32 %v366_v35, %v365_v28 }
  0xe6   :  { %766 = vmatpush3.bf16.msra.mxu1 %v804_v60 }
  0xe7   :  { %v385_v37 = vrot.slane %v384_v30, 2  ;;  %v374_v47 = vadd.f32 %v373_v40, %v372_v33  ;;  %v404_v48 = vsel %vm403_vm6, %v367_v41, %v402_v43  ;;  %767 = vmatprep.subr.bf16.mxu1 %v930_v1 }
  0xe9   :  { %v386_v42 = vadd.f32 %v385_v37, %v384_v30  ;;  %v406_v51 = vsel %vm405_vm7, %v374_v47, %v404_v48 }
  0xea   :  { %v408_v53 = vsel %vm407_vm8, %v381_v50, %v406_v51  ;;  %768 = vmatpush3.bf16.msra.mxu1 %v805_v61 }
  0xeb   :  { %v387_v49 = vrot.slane %v386_v42, 1  ;;  %769 = vmatprep.subr.bf16.mxu1 %v930_v1 }
  0xed   :  { %v388_v52 = vadd.f32 %v387_v49, %v386_v42 }
  0xee   :  { %770 = vmatpush3.bf16.msra.mxu1 %v806_v62 }
  0xef   :  { %v410_v54 = vsel %vm409_vm9, %v388_v52, %v408_v53  ;;  %771 = vmatprep.subr.bf16.mxu1 %v930_v1 }
  0xf2   :  { %772 = vmatpush3.bf16.msra.mxu1 %v807_v63 }
  0xf3   :  { %773 = vmatprep.subr.bf16.mxu1 %v930_v1 }
  0xf6   :  { %774 = vmatpush3.bf16.msra.mxu1 %v808_v0 }
  0xf7   :  { %775 = vmatprep.subr.bf16.mxu1 %v930_v1 }
  0xfa   :  { %776 = vmatpush3.bf16.msra.mxu1 %v809_v2 }
 0x155   :  { %v433_v55 = vpop.permute.xlu0 %432 }
 0x156   :  { %v435_v56 = vmul.f32 %v433_v55, %v410_v54 }
 0x158   :  { %v436_v57 = vpack.c.bf16 %v435_v56, %v435_v56 }
 0x15a   :  { %758 = vmatmul.mubr.bf16.vlgmr.msra.gmra.mxu0 %v436_v57 }
 0x21a   :  { %v542_v3 = vpop.f32.mrf.mxu0 }
 0x21b   :  { %v543_v46 = vadd.f32 %v705_v45, %v542_v3 }
 0x21c   :  { %v759_v4 = vpop.f32.mrf.mxu0 }
 0x21d   :  { %v549_v5 = vmul.f32 0.70710677, %v543_v46  ;;  %v548_v28 = vmul.f32 0.5, %v543_v46 }
 0x21e   :  { %v545_v6 = vpop.f32.mrf.mxu0 }
 0x21f   :  { %v550_v7 = vand.u32 2147483647, %v549_v5  ;;  %vm570_vm10 = vcmp.lt.f32.partialorder %v549_v5, 0.0 }
 0x220   :  { %v760_v8 = vpop.f32.mrf.mxu0 }
 0x221   :  { %v551_v9 = vmul.f32 0.3275911, %v550_v7  ;;  %v564_v11 = vsub.f32 0.0, %v550_v7 }
 0x223   :  { %v552_v10 = vadd.f32 1.0, %v551_v9  ;;  %v565_v12 = vmul.f32 %v564_v11, %v550_v7 }
 0x225   :  { %812 = vrcp.f32 %v552_v10  ;;  %v566_v14 = vmul.f32 1.442695, %v565_v12 }
 0x227   :  { %814 = vpow2.f32 %v566_v14 }
 0x232   :  { %v813_v13 = vpop.eup %812 }
 0x233   :  { %v555_v1 = vmul.f32 1.0614054, %v813_v13 }
 0x234   :  { %v815_v23 = vpop.eup %814 }
 0x235   :  { %v556_v15 = vadd.f32 -1.4531521, %v555_v1 }
 0x237   :  { %v557_v16 = vmul.f32 %v813_v13, %v556_v15 }
 0x239   :  { %v558_v17 = vadd.f32 1.4214138, %v557_v16 }
 0x23b   :  { %v559_v18 = vmul.f32 %v813_v13, %v558_v17 }
 0x23d   :  { %v560_v19 = vadd.f32 -0.28449672, %v559_v18 }
 0x23f   :  { %v561_v20 = vmul.f32 %v813_v13, %v560_v19 }
 0x241   :  { %v562_v21 = vadd.f32 0.2548296, %v561_v20 }
 0x243   :  { %v563_v22 = vmul.f32 %v813_v13, %v562_v21 }
 0x245   :  { %v568_v24 = vmul.f32 %v815_v23, %v563_v22 }
 0x247   :  { %v569_v25 = vsub.f32 1.0, %v568_v24 }
 0x249   :  { %v571_v26 = vsub.f32 0.0, %v569_v25 }
 0x24b   :  { %v572_v27 = vsel %vm570_vm10, %v571_v26, %v569_v25 }
 0x24c   :  { %v573_v29 = vadd.f32 1.0, %v572_v27 }
 0x24e   :  { %v574_v30 = vmul.f32 %v573_v29, %v548_v28 }
 0x250   :  { %v575_v31 = vpack.c.bf16 %v574_v30, %v574_v30 }
 0x252   :  { %778 = vmatmul.mubr.bf16.vlgmr.msra.gmra.mxu1 %v575_v31 }
 0x312   :  { %v681_v33 = vpop.f32.mrf.mxu1 }
 0x313   :  { %v682_v34 = vadd.f32 %v714_v32, %v681_v33 }
 0x314   :  { %v779_v35 = vpop.f32.mrf.mxu1 }
 0x315   :  { %687 = vst [vmem:[#allocation12] sm:$0xff] %v682_v34 }
 0x316   :  { %v684_v36 = vpop.f32.mrf.mxu1 }
 0x317   :  { %907 = shalt.err (!%p904_p10)
}
 0x318   :  { %697 = dma.vmem_to_hbm [thread:$0]  %s695_s19, 128, %s1047_s6, [#allocation6]   ;;  %v780_v37 = vpop.f32.mrf.mxu1 }
 0x319   :  { %922 = dma.done.wait [#allocation6], 128  }
 0x31a   :  { %923 = vsyncadd [#allocation6], 4294967168 }
 0x31b   :  { %701 = vsyncpa [#allocation5], 1 }
 0x31c   :  { %702 = vsyncpa [#allocation8], 1 }
 0x31d   :  { %703 = vsyncpa [#allocation11], 1 }
 0x31e   :  { %704 = vsyncpa [#allocation6], 1 }

</bundles_post_ra>
